<compile_context>
chip_gen: v5e
topology: v5e:2x2
jax: 0.10.0
libtpu: 0.0.40
codegen_flags: <defaults>
</compile_context>

<pallas_src>
import functools

import jax
import jax.numpy as jnp
from jax.experimental import pallas as pl
from jax.experimental.pallas import tpu as pltpu

# ----------------------------------------------------------------------------
# Config
# ----------------------------------------------------------------------------
EMBED_DIMS = (64, 128, 320, 512)
NUM_HEADS = (1, 2, 4, 8)
MLP_RATIOS = (4, 4, 4, 4)
DEPTHS = (3, 4, 6, 3)
SR_RATIOS = (8, 4, 2, 1)
EMBEDDING_DIM = 32
OUTPUT_NC = 2
IN_CHANS = 3
LN_EPS = 1e-5  # PyTorch nn.LayerNorm default


def _round_up(x, m):
    return ((x + m - 1) // m) * m


def _row_tiling(m, cap=512):
    """Largest multiple-of-8 row tile <= cap that divides the (padded) M."""
    mp = _round_up(m, 8)
    bm = min(mp, cap)
    while mp % bm:
        bm -= 8
    return mp, bm


def _q_tile(n, cap=512):
    if n <= cap:
        return n
    t = cap
    while t > 8 and n % t:
        t -= 8
    return t if n % t == 0 else n


_PAR1 = pltpu.CompilerParams(dimension_semantics=("parallel",))
_PAR2 = pltpu.CompilerParams(dimension_semantics=("parallel", "parallel"))


# ----------------------------------------------------------------------------
# Fused matmul kernel: [LayerNorm | abs-diff] prologue -> bf16 MXU dot ->
# bias (+ReLU) (+residual) epilogue.
# ----------------------------------------------------------------------------
def _mm_kernel(*refs, mode, act, has_res, eps):
    if mode == "ln":
        a_ref, g_ref, bt_ref, w_ref, b_ref = refs[:5]
        rest = refs[5:]
        x = a_ref[...].astype(jnp.float32)
        mu = jnp.mean(x, axis=-1, keepdims=True)
        xc = x - mu
        var = jnp.mean(xc * xc, axis=-1, keepdims=True)
        a = (xc * jax.lax.rsqrt(var + eps) * g_ref[...] + bt_ref[...]).astype(jnp.bfloat16)
    elif mode == "absdiff":
        a1_ref, a2_ref, w_ref, b_ref = refs[:4]
        rest = refs[4:]
        a = jnp.abs(a1_ref[...].astype(jnp.float32)
                    - a2_ref[...].astype(jnp.float32)).astype(jnp.bfloat16)
    else:
        a_ref, w_ref, b_ref = refs[:3]
        rest = refs[3:]
        a = a_ref[...].astype(jnp.bfloat16)

    acc = jnp.dot(a, w_ref[...], preferred_element_type=jnp.float32) + b_ref[...]
    if act == "relu":
        acc = jnp.maximum(acc, 0.0)
    if has_res:
        res_ref, o_ref = rest
        acc = acc + res_ref[...].astype(jnp.float32)
    else:
        (o_ref,) = rest
    o_ref[...] = acc.astype(o_ref.dtype)


@functools.partial(jax.jit, static_argnames=("mode", "act", "eps", "out_dtype", "cap"))
def matmul_fused(a, w, bias, *, a2=None, ln_g=None, ln_b=None, residual=None,
                 mode="plain", act="none", eps=LN_EPS, out_dtype=jnp.bfloat16, cap=512):
    """(M, K) @ (K, N) + bias, rows tiled on a 1-D 'parallel' grid."""
    M, K = a.shape
    N = w.shape[1]
    Mp, bm = _row_tiling(M, cap)
    pad = Mp - M

    def prow(t):
        return jnp.pad(t, ((0, pad), (0, 0))) if pad else t

    row_k = pl.BlockSpec((bm, K), lambda i: (i, 0))
    const_k = pl.BlockSpec((1, K), lambda i: (0, 0))
    w_spec = pl.BlockSpec((K, N), lambda i: (0, 0))
    b_spec = pl.BlockSpec((1, N), lambda i: (0, 0))
    row_n = pl.BlockSpec((bm, N), lambda i: (i, 0))

    ops, specs = [], []
    if mode == "ln":
        ops += [prow(a), ln_g.reshape(1, K).astype(jnp.float32),
                ln_b.reshape(1, K).astype(jnp.float32)]
        specs += [row_k, const_k, const_k]
    elif mode == "absdiff":
        ops += [prow(a), prow(a2)]
        specs += [row_k, row_k]
    else:
        ops += [prow(a)]
        specs += [row_k]
    ops += [w.astype(jnp.bfloat16), bias.reshape(1, N).astype(jnp.float32)]
    specs += [w_spec, b_spec]
    has_res = residual is not None
    if has_res:
        ops.append(prow(residual))
        specs.append(row_n)

    out = pl.pallas_call(
        functools.partial(_mm_kernel, mode=mode, act=act, has_res=has_res, eps=eps),
        out_shape=jax.ShapeDtypeStruct((Mp, N), out_dtype),
        grid=(Mp // bm,),
        in_specs=specs,
        out_specs=row_n,
        compiler_params=_PAR1,
    )(*ops)
    return out[:M] if pad else out


# ----------------------------------------------------------------------------
# Standalone LayerNorm (only where the normalized tensor is reused spatially)
# ----------------------------------------------------------------------------
def _ln_kernel(x_ref, g_ref, b_ref, o_ref, *, eps):
    x = x_ref[...].astype(jnp.float32)
    mu = jnp.mean(x, axis=-1, keepdims=True)
    xc = x - mu
    var = jnp.mean(xc * xc, axis=-1, keepdims=True)
    o_ref[...] = (xc * jax.lax.rsqrt(var + eps) * g_ref[...] + b_ref[...]).astype(o_ref.dtype)


@functools.partial(jax.jit, static_argnames=("eps",))
def layer_norm(x, w, b, *, eps=LN_EPS):
    M, C = x.shape
    Mp, bm = _row_tiling(M)
    xp = jnp.pad(x, ((0, Mp - M), (0, 0))) if Mp != M else x
    out = pl.pallas_call(
        functools.partial(_ln_kernel, eps=eps),
        out_shape=jax.ShapeDtypeStruct((Mp, C), jnp.bfloat16),
        grid=(Mp // bm,),
        in_specs=[
            pl.BlockSpec((bm, C), lambda i: (i, 0)),
            pl.BlockSpec((1, C), lambda i: (0, 0)),
            pl.BlockSpec((1, C), lambda i: (0, 0)),
        ],
        out_specs=pl.BlockSpec((bm, C), lambda i: (i, 0)),
        compiler_params=_PAR1,
    )(xp, w.reshape(1, C).astype(jnp.float32), b.reshape(1, C).astype(jnp.float32))
    return out[:M] if Mp != M else out


# ----------------------------------------------------------------------------
# Attention: Nq-tiled, bf16 operands, f32 softmax, approx reciprocal on EUP
# ----------------------------------------------------------------------------
def _attention_kernel(q_ref, k_ref, v_ref, o_ref, *, scale):
    q = q_ref[0]
    k = k_ref[0]
    v = v_ref[0]
    s = jax.lax.dot_general(q, k, (((1,), (1,)), ((), ())),
                            preferred_element_type=jnp.float32) * scale
    s = s - jnp.max(s, axis=-1, keepdims=True)
    p = jnp.exp(s)
    p = p * pl.reciprocal(jnp.sum(p, axis=-1, keepdims=True), approx=True)
    o_ref[0] = jnp.dot(p.astype(jnp.bfloat16), v,
                       preferred_element_type=jnp.float32).astype(o_ref.dtype)


@functools.partial(jax.jit, static_argnames=("scale",))
def attention(q, k, v, *, scale):
    """q: (BH, Nq, dh), k/v: (BH, Nk, dh), all bf16."""
    BH, Nq, dh = q.shape
    Nk = k.shape[1]
    tq = _q_tile(Nq)
    return pl.pallas_call(
        functools.partial(_attention_kernel, scale=scale),
        out_shape=jax.ShapeDtypeStruct((BH, Nq, dh), jnp.bfloat16),
        grid=(BH, Nq // tq),
        in_specs=[
            pl.BlockSpec((1, tq, dh), lambda i, j: (i, j, 0)),
            pl.BlockSpec((1, Nk, dh), lambda i, j: (i, 0, 0)),
            pl.BlockSpec((1, Nk, dh), lambda i, j: (i, 0, 0)),
        ],
        out_specs=pl.BlockSpec((1, tq, dh), lambda i, j: (i, j, 0)),
        compiler_params=_PAR2,
    )(q, k, v)


# ----------------------------------------------------------------------------
# Depthwise 3x3 conv + GELU epilogue, channel-tiled grid (B, C/ct)
# ----------------------------------------------------------------------------
def _dwconv_gelu_kernel(x_ref, w_ref, b_ref, o_ref):
    H, W, C = o_ref.shape[1], o_ref.shape[2], o_ref.shape[3]
    acc = jnp.zeros((H, W, C), jnp.float32)
    for dy in range(3):
        for dx in range(3):
            acc = acc + x_ref[0, dy:dy + H, dx:dx + W, :].astype(jnp.float32) \
                * w_ref[dy * 3 + dx, :].reshape(1, 1, C)
    acc = acc + b_ref[0].reshape(1, 1, C)
    # TODO(synk): tanh-approx GELU (EUP); reference nn.GELU uses exact erf.
    g = 0.5 * acc * (1.0 + jnp.tanh(0.7978845608028654
                                    * (acc + 0.044715 * acc * acc * acc)))
    o_ref[0] = g.astype(o_ref.dtype)


@jax.jit
def dwconv3x3_gelu(x, w9, b):
    """x: (B,H,W,C) bf16, w9: (9,C) f32, b: (C,) f32."""
    B, H, W, C = x.shape
    xp = jnp.pad(x, ((0, 0), (1, 1), (1, 1), (0, 0)))
    if C % 256 == 0:
        ct = 256
    elif C % 128 == 0:
        ct = 128
    else:
        ct = C
    return pl.pallas_call(
        _dwconv_gelu_kernel,
        out_shape=jax.ShapeDtypeStruct((B, H, W, C), jnp.bfloat16),
        grid=(B, C // ct),
        in_specs=[
            pl.BlockSpec((1, H + 2, W + 2, ct), lambda i, j: (i, 0, 0, j)),
            pl.BlockSpec((9, ct), lambda i, j: (0, j)),
            pl.BlockSpec((1, ct), lambda i, j: (0, j)),
        ],
        out_specs=pl.BlockSpec((1, H, W, ct), lambda i, j: (i, 0, 0, j)),
        compiler_params=_PAR2,
    )(xp, w9.astype(jnp.float32), b.reshape(1, C).astype(jnp.float32))


# ----------------------------------------------------------------------------
# Direct stride-1 conv kernel (no im2col): accumulates kh*kw shifted dots.
# Optional ReLU and fused (scaled) residual add in the epilogue.
# ----------------------------------------------------------------------------
def _conv_kernel(*refs, kh, kw, act, has_res, res_scale):
    if has_res:
        x_ref, w_ref, b_ref, r_ref, o_ref = refs
    else:
        x_ref, w_ref, b_ref, o_ref = refs
    oh, ow, O = o_ref.shape[1], o_ref.shape[2], o_ref.shape[3]
    C = x_ref.shape[3]
    acc = jnp.zeros((oh * ow, O), jnp.float32)
    for dy in range(kh):
        for dx in range(kw):
            patch = x_ref[0, dy:dy + oh, dx:dx + ow, :].reshape(oh * ow, C)
            acc = acc + jnp.dot(patch, w_ref[dy * kw + dx],
                                preferred_element_type=jnp.float32)
    acc = acc + b_ref[...]
    if act == "relu":
        acc = jnp.maximum(acc, 0.0)
    if has_res:
        acc = acc * res_scale + r_ref[0].reshape(oh * ow, O).astype(jnp.float32)
    o_ref[...] = acc.reshape(1, oh, ow, O).astype(o_ref.dtype)


@functools.partial(jax.jit,
                   static_argnames=("kh", "kw", "act", "res_scale", "out_dtype"))
def conv2d_direct(xp, w, b, *, kh, kw, act="none", residual=None, res_scale=1.0,
                  out_dtype=jnp.bfloat16):
    """xp: pre-padded (B, oh+kh-1, ow+kw-1, Cin); w: (kh*kw, Cin, Cout); b: (Cout,)."""
    B, Hp, Wp, C = xp.shape
    oh, ow = Hp - kh + 1, Wp - kw + 1
    O = w.shape[-1]
    ops = [xp.astype(jnp.bfloat16), w.astype(jnp.bfloat16),
           b.reshape(1, O).astype(jnp.float32)]
    specs = [
        pl.BlockSpec((1, Hp, Wp, C), lambda i: (i, 0, 0, 0)),
        pl.BlockSpec((kh * kw, C, O), lambda i: (0, 0, 0)),
        pl.BlockSpec((1, O), lambda i: (0, 0)),
    ]
    has_res = residual is not None
    if has_res:
        ops.append(residual)
        specs.append(pl.BlockSpec((1, oh, ow, O), lambda i: (i, 0, 0, 0)))
    return pl.pallas_call(
        functools.partial(_conv_kernel, kh=kh, kw=kw, act=act,
                          has_res=has_res, res_scale=res_scale),
        out_shape=jax.ShapeDtypeStruct((B, oh, ow, O), out_dtype),
        grid=(B,),
        in_specs=specs,
        out_specs=pl.BlockSpec((1, oh, ow, O), lambda i: (i, 0, 0, 0)),
        compiler_params=_PAR1,
    )(*ops)


# ----------------------------------------------------------------------------
# Strided conv via im2col + Pallas matmul (patch embeds & sr convs only; the
# overlap blow-up there is <= 2.25x, and zero when kernel == stride).
# ----------------------------------------------------------------------------
@functools.partial(jax.jit, static_argnames=("stride", "padding", "act"))
def conv2d_im2col(x, w, b, *, stride=1, padding=0, act="none"):
    """x: (B,H,W,Cin) bf16;  w: (Cout,Cin,kh,kw) PyTorch layout;  b: (Cout,)."""
    B, H, W, C = x.shape
    O, _, kh, kw = w.shape
    xp = jnp.pad(x, ((0, 0), (padding, padding), (padding, padding), (0, 0)))
    oh = (H + 2 * padding - kh) // stride + 1
    ow = (W + 2 * padding - kw) // stride + 1
    cols = []
    for dy in range(kh):
        for dx in range(kw):
            cols.append(xp[:, dy:dy + stride * (oh - 1) + 1:stride,
                           dx:dx + stride * (ow - 1) + 1:stride, :])
    cols = jnp.stack(cols, axis=3).reshape(B * oh * ow, kh * kw * C)
    wmat = jnp.transpose(w, (2, 3, 1, 0)).reshape(kh * kw * C, O).astype(jnp.bfloat16)
    out = matmul_fused(cols, wmat, b, act=act)
    return out.reshape(B, oh, ow, O)


# ----------------------------------------------------------------------------
# ConvTranspose2d(k=4, s=2, p=1) as 4 stride-phase 2x2 convs (no zero dilation)
# ----------------------------------------------------------------------------
@jax.jit
def conv_transpose2d_phase(x, sub_w, b):
    """x: (B,H,W,Cin) bf16; sub_w: (2,2,4,Cin,Cout); b: (Cout,)."""
    B, H, W, _ = x.shape
    O = sub_w.shape[-1]
    phases = []
    for ry in range(2):
        row = []
        for rx in range(2):
            pad_y = (1, 0) if ry == 0 else (0, 1)
            pad_x = (1, 0) if rx == 0 else (0, 1)
            xp = jnp.pad(x, ((0, 0), pad_y, pad_x, (0, 0)))
            row.append(conv2d_direct(xp, sub_w[ry, rx], b, kh=2, kw=2))
        phases.append(row)
    r0 = jnp.stack([phases[0][0], phases[0][1]], axis=3)   # (B,H,W,2,O)
    r1 = jnp.stack([phases[1][0], phases[1][1]], axis=3)
    out = jnp.stack([r0, r1], axis=2)                       # (B,H,2,W,2,O)
    return out.reshape(B, 2 * H, 2 * W, O)


@functools.partial(jax.jit, static_argnames=("out_h", "out_w"))
def bilinear_resize(x, *, out_h, out_w):
    """F.interpolate(mode='bilinear', align_corners=True).  x: NHWC.  (JAX glue)"""
    B, H, W, C = x.shape

    def coords(out_size, in_size):
        if out_size == 1:
            src = jnp.zeros((1,), jnp.float32)
        else:
            src = jnp.arange(out_size, dtype=jnp.float32) * ((in_size - 1) / (out_size - 1))
        i0 = jnp.clip(jnp.floor(src).astype(jnp.int32), 0, in_size - 1)
        frac = src - i0.astype(jnp.float32)
        i1 = jnp.minimum(i0 + 1, in_size - 1)
        return i0, i1, frac

    y0, y1, fy = coords(out_h, H)
    x0, x1, fx = coords(out_w, W)
    rows0 = x[:, y0]
    rows1 = x[:, y1]
    fy = fy[None, :, None, None]
    fx = fx[None, None, :, None]
    top = rows0[:, :, x0] * (1 - fx) + rows0[:, :, x1] * fx
    bot = rows1[:, :, x0] * (1 - fx) + rows1[:, :, x1] * fx
    return top * (1 - fy) + bot * fy


# ----------------------------------------------------------------------------
# Parameters (deterministic synthetic init) + one-time prep / composition
# ----------------------------------------------------------------------------
class ParamGen:
    def __init__(self, seed):
        self.key = jax.random.PRNGKey(seed)

    def normal(self, shape, scale=0.02):
        self.key, sub = jax.random.split(self.key)
        return jax.random.normal(sub, shape, jnp.float32) * scale

    @staticmethod
    def zeros(shape):
        return jnp.zeros(shape, jnp.float32)

    @staticmethod
    def ones(shape):
        return jnp.ones(shape, jnp.float32)


def init_tenc_params(g):
    patch, blocks, norms = [], [], []
    cfg = [(7, IN_CHANS, EMBED_DIMS[0]),
           (3, EMBED_DIMS[0], EMBED_DIMS[1]),
           (3, EMBED_DIMS[1], EMBED_DIMS[2]),
           (3, EMBED_DIMS[2], EMBED_DIMS[3])]
    bf = jnp.bfloat16
    for s, (k, ci, co) in enumerate(cfg):
        patch.append({"w": g.normal((co, ci, k, k)), "b": g.zeros((co,)),
                      "ln_w": g.ones((co,)), "ln_b": g.zeros((co,))})
        dim, sr = co, SR_RATIOS[s]
        hid = dim * MLP_RATIOS[s]
        stage = []
        for _ in range(DEPTHS[s]):
            dw = g.normal((hid, 1, 3, 3))
            blk = {
                "norm1_w": g.ones((dim,)), "norm1_b": g.zeros((dim,)),
                "q_w": g.normal((dim, dim)).astype(bf), "q_b": g.zeros((dim,)),
                "kv_w": g.normal((dim, 2 * dim)).astype(bf), "kv_b": g.zeros((2 * dim,)),
                "proj_w": g.normal((dim, dim)).astype(bf), "proj_b": g.zeros((dim,)),
                "norm2_w": g.ones((dim,)), "norm2_b": g.zeros((dim,)),
                "fc1_w": g.normal((dim, hid)).astype(bf), "fc1_b": g.zeros((hid,)),
                "dw_w9": jnp.transpose(dw[:, 0], (1, 2, 0)).reshape(9, hid),
                "dw_b": g.zeros((hid,)),
                "fc2_w": g.normal((hid, dim)).astype(bf), "fc2_b": g.zeros((dim,)),
            }
            if sr > 1:
                blk.update({"sr_w": g.normal((dim, dim, sr, sr)),
                            "sr_b": g.zeros((dim,)),
                            "sr_ln_w": g.ones((dim,)),
                            "sr_ln_b": g.zeros((dim,))})
            stage.append(blk)
        blocks.append(stage)
        norms.append({"w": g.ones((dim,)), "b": g.zeros((dim,))})
    return {"patch": patch, "blocks": blocks, "norm": norms}


def prep_tenc_params(raw):
    """For sr_ratio == 1 blocks, pre-concatenate q and kv into one qkv matmul."""
    p = {"patch": raw["patch"], "norm": raw["norm"], "blocks": []}
    for s, stage in enumerate(raw["blocks"]):
        new_stage = []
        for blk in stage:
            blk = dict(blk)
            if SR_RATIOS[s] == 1:
                blk["qkv_w"] = jnp.concatenate([blk["q_w"], blk["kv_w"]], axis=1)
                blk["qkv_b"] = jnp.concatenate([blk["q_b"], blk["kv_b"]], axis=0)
                del blk["q_w"], blk["q_b"], blk["kv_w"], blk["kv_b"]
            new_stage.append(blk)
        p["blocks"].append(new_stage)
    return p


def init_tdec_params(g):
    e = EMBEDDING_DIM
    p = {"linear_c": [{"w": g.normal((c, e)), "b": g.zeros((e,))} for c in EMBED_DIMS],
         "fuse_w": g.normal((e, 4 * e, 1, 1)), "fuse_b": g.zeros((e,)),
         "convd2x_w": g.normal((e, e, 4, 4)), "convd2x_b": g.zeros((e,)),
         "convd1x_w": g.normal((e, e, 4, 4)), "convd1x_b": g.zeros((e,)),
         "pred_w": g.normal((OUTPUT_NC, e, 3, 3)), "pred_b": g.zeros((OUTPUT_NC,))}
    for name in ("dense_2x", "dense_1x"):
        p[name] = {"c1_w": g.normal((e, e, 3, 3)), "c1_b": g.zeros((e,)),
                   "c2_w": g.normal((e, e, 3, 3)), "c2_b": g.zeros((e,))}
    return p


def _transpose_conv_phases(wt):
    """(Cin,Cout,4,4) ConvTranspose2d weight -> (2,2,4,Cin,Cout) phase sub-kernels."""
    idx = ((3, 1), (2, 0))  # even phase taps, odd phase taps (per spatial dim)
    rows = []
    for ry in range(2):
        cols = []
        for rx in range(2):
            taps = [wt[:, :, idx[ry][a], idx[rx][bb]]
                    for a in range(2) for bb in range(2)]
            cols.append(jnp.stack(taps, axis=0))       # (4, Cin, Cout)
        rows.append(jnp.stack(cols, axis=0))
    return jnp.stack(rows, axis=0).astype(jnp.bfloat16)  # (2, 2, 4, Cin, Cout)


def prep_tdec_params(raw):
    """Pre-compose linear_c with the 1x1 fuse conv and re-layout conv weights."""
    e = EMBEDDING_DIM
    wf_mat = raw["fuse_w"][:, :, 0, 0].T          # (4e, e), rows = concat order c4,c3,c2,c1
    block_of = {3: 0, 2: 1, 1: 2, 0: 3}
    proj_w, proj_b = [], []
    for i in range(4):
        wp = raw["linear_c"][i]["w"]
        bp = raw["linear_c"][i]["b"]
        wfb = wf_mat[block_of[i] * e:(block_of[i] + 1) * e]
        proj_w.append((wp @ wfb).astype(jnp.bfloat16))
        proj_b.append(bp @ wfb)

    def conv9(w):  # (O, Cin, 3, 3) -> (9, Cin, O)
        return jnp.transpose(w, (2, 3, 1, 0)).reshape(9, w.shape[1], w.shape[0]).astype(jnp.bfloat16)

    p = {"proj_w": proj_w, "proj_b": proj_b, "fuse_b": raw["fuse_b"],
         "convd2x_sub": _transpose_conv_phases(raw["convd2x_w"]),
         "convd2x_b": raw["convd2x_b"],
         "convd1x_sub": _transpose_conv_phases(raw["convd1x_w"]),
         "convd1x_b": raw["convd1x_b"],
         "pred_w": conv9(raw["pred_w"]), "pred_b": raw["pred_b"]}
    for name in ("dense_2x", "dense_1x"):
        p[name] = {"c1_w": conv9(raw[name]["c1_w"]), "c1_b": raw[name]["c1_b"],
                   "c2_w": conv9(raw[name]["c2_w"]), "c2_b": raw[name]["c2_b"]}
    return p


# ----------------------------------------------------------------------------
# Model forward
# ----------------------------------------------------------------------------
def tenc_forward(p, x):
    B = x.shape[0]
    outs = []
    for s in range(4):
        pe = p["patch"][s]
        k = 7 if s == 0 else 3
        st = 4 if s == 0 else 2
        x = conv2d_im2col(x, pe["w"], pe["b"], stride=st, padding=k // 2)
        _, H, W, C = x.shape
        n = H * W
        n_tok = B * n
        tok = layer_norm(x.reshape(n_tok, C), pe["ln_w"], pe["ln_b"])

        heads = NUM_HEADS[s]
        dh = C // heads
        scale = float(dh) ** -0.5
        sr = SR_RATIOS[s]

        for blk in p["blocks"][s]:
            # ---- efficient self-attention ----
            if sr > 1:
                t = layer_norm(tok, blk["norm1_w"], blk["norm1_b"])
                q = matmul_fused(t, blk["q_w"], blk["q_b"])
                t_sr = conv2d_im2col(t.reshape(B, H, W, C), blk["sr_w"], blk["sr_b"],
                                     stride=sr, padding=0)
                nk = t_sr.shape[1] * t_sr.shape[2]
                kv = matmul_fused(t_sr.reshape(B * nk, C), blk["kv_w"], blk["kv_b"],
                                  ln_g=blk["sr_ln_w"], ln_b=blk["sr_ln_b"], mode="ln")
            else:
                nk = n
                qkv = matmul_fused(tok, blk["qkv_w"], blk["qkv_b"],
                                   ln_g=blk["norm1_w"], ln_b=blk["norm1_b"], mode="ln")
                q = qkv[:, :C]
                kv = qkv[:, C:]
            q = q.reshape(B, n, heads, dh).transpose(0, 2, 1, 3).reshape(B * heads, n, dh)
            kv = kv.reshape(B, nk, 2, heads, dh).transpose(2, 0, 3, 1, 4)
            kk = kv[0].reshape(B * heads, nk, dh)
            vv = kv[1].reshape(B * heads, nk, dh)
            a = attention(q, kk, vv, scale=scale)
            a = a.reshape(B, heads, n, dh).transpose(0, 2, 1, 3).reshape(n_tok, C)
            tok = matmul_fused(a, blk["proj_w"], blk["proj_b"], residual=tok)

            # ---- Mix-FFN (LN fused into fc1, GELU fused into dwconv, residual into fc2)
            h1 = matmul_fused(tok, blk["fc1_w"], blk["fc1_b"],
                              ln_g=blk["norm2_w"], ln_b=blk["norm2_b"], mode="ln")
            hid = h1.shape[-1]
            h1 = dwconv3x3_gelu(h1.reshape(B, H, W, hid), blk["dw_w9"], blk["dw_b"])
            tok = matmul_fused(h1.reshape(n_tok, hid), blk["fc2_w"], blk["fc2_b"],
                               residual=tok)

        tok = layer_norm(tok, p["norm"][s]["w"], p["norm"][s]["b"])
        x = tok.reshape(B, H, W, C)
        outs.append(x)
    return outs


def decoder_residual_block(x, rp):
    # TODO(synk): reference ResidualBlock scales the conv branch by 0.1 and uses
    # zero padding here; reflection padding of the original ConvLayer is not modeled.
    xp = jnp.pad(x, ((0, 0), (1, 1), (1, 1), (0, 0)))
    y = conv2d_direct(xp, rp["c1_w"], rp["c1_b"], kh=3, kw=3, act="relu")
    yp = jnp.pad(y, ((0, 0), (1, 1), (1, 1), (0, 0)))
    return conv2d_direct(yp, rp["c2_w"], rp["c2_b"], kh=3, kw=3,
                         residual=x, res_scale=0.1)


def tdec_forward(p, fx1, fx2):
    """abs-diff of encoder features is fused into the projection matmuls."""
    B, h1, w1, _ = fx1[0].shape
    e = EMBEDDING_DIM

    def proj_absdiff(i):
        a, b = fx1[i], fx2[i]
        bb, h, w, ci = a.shape
        out = matmul_fused(a.reshape(bb * h * w, ci), p["proj_w"][i], p["proj_b"][i],
                           a2=b.reshape(bb * h * w, ci), mode="absdiff")
        return out.reshape(bb, h, w, e)

    r4 = bilinear_resize(proj_absdiff(3), out_h=h1, out_w=w1)
    r3 = bilinear_resize(proj_absdiff(2), out_h=h1, out_w=w1)
    r2 = bilinear_resize(proj_absdiff(1), out_h=h1, out_w=w1)
    r1 = proj_absdiff(0)
    _c = (r4.astype(jnp.float32) + r3.astype(jnp.float32) + r2.astype(jnp.float32)
          + r1.astype(jnp.float32) + p["fuse_b"].reshape(1, 1, 1, e)).astype(jnp.bfloat16)

    x = conv_transpose2d_phase(_c, p["convd2x_sub"], p["convd2x_b"])
    x = decoder_residual_block(x, p["dense_2x"])
    x = conv_transpose2d_phase(x, p["convd1x_sub"], p["convd1x_b"])
    x = decoder_residual_block(x, p["dense_1x"])
    xp = jnp.pad(x, ((0, 0), (1, 1), (1, 1), (0, 0)))
    return conv2d_direct(xp, p["pred_w"], p["pred_b"], kh=3, kw=3,
                         out_dtype=jnp.float32)


@jax.jit
def changeformer_v2_forward(params, inputs):
    x1 = jnp.transpose(inputs["img_1"], (0, 2, 3, 1)).astype(jnp.bfloat16)  # NCHW -> NHWC
    x2 = jnp.transpose(inputs["img_2"], (0, 2, 3, 1)).astype(jnp.bfloat16)
    B = x1.shape[0]
    # Single encoder pass over both images (no cross-batch coupling in Tenc).
    feats = tenc_forward(params["tenc"], jnp.concatenate([x1, x2], axis=0))
    fx1 = [f[:B] for f in feats]
    fx2 = [f[B:] for f in feats]
    cp = tdec_forward(params["tdec"], fx1, fx2)
    return jnp.transpose(cp, (0, 3, 1, 2)).astype(jnp.float32)  # NCHW (B, output_nc, H, W)


# ----------------------------------------------------------------------------
# Demo
# ----------------------------------------------------------------------------
if __name__ == "__main__":
    B, H, W = 2, 64, 64  # smallest size compatible with stride-4 embeds + sr=8
    key = jax.random.PRNGKey(0)
    k1, k2 = jax.random.split(key)
    inputs = {"img_1": jax.random.normal(k1, (B, IN_CHANS, H, W), jnp.float32),
              "img_2": jax.random.normal(k2, (B, IN_CHANS, H, W), jnp.float32)}

    gen = ParamGen(0)
    params = {"tenc": prep_tenc_params(init_tenc_params(gen)),
              "tdec": prep_tdec_params(init_tdec_params(gen))}

    out = changeformer_v2_forward(params, inputs)
    out = jax.block_until_ready(out)
    assert out.shape == (B, OUTPUT_NC, H, W), out.shape
    assert bool(jnp.all(jnp.isfinite(out)))
    print("KERNEL_OK")
</pallas_src>

<mosaic_0001>
module attributes {stable_mosaic.version = 11 : i64} {
  func.func @_mm_kernel(%arg0: i32, %arg1: memref<512x147xbf16, #tpu.memory_space<vmem>>, %arg2: memref<147x64xbf16, #tpu.memory_space<vmem>>, %arg3: memref<1x64xf32, #tpu.memory_space<vmem>>, %arg4: memref<512x64xbf16, #tpu.memory_space<vmem>>) attributes {dimension_semantics = [#tpu.dimension_semantics<parallel>], iteration_bounds = array<i64: 2>, scalar_prefetch = 0 : i64, scratch_operands = 0 : i64, tpu.core_type = #tpu.core_type<tc>, window_params = [{transform_indices = @transform_0, window_bounds = array<i64: 512, 147>}, {pipeline_mode = #tpu.pipeline_mode<synchronous>, transform_indices = @transform_1, window_bounds = array<i64: 147, 64>}, {pipeline_mode = #tpu.pipeline_mode<synchronous>, transform_indices = @transform_2, window_bounds = array<i64: 1, 64>}, {transform_indices = @transform_3, window_bounds = array<i64: 512, 64>}]} {
    %c0 = arith.constant 0 : index
    %c0_0 = arith.constant 0 : index
    %0 = vector.load %arg1[%c0, %c0_0] : memref<512x147xbf16, #tpu.memory_space<vmem>>, vector<512x147xbf16>
    %c0_1 = arith.constant 0 : index
    %c0_2 = arith.constant 0 : index
    %1 = vector.load %arg2[%c0_1, %c0_2] : memref<147x64xbf16, #tpu.memory_space<vmem>>, vector<147x64xbf16>
    %cst = arith.constant dense<0.000000e+00> : vector<512x64xf32>
    %2 = tpu.matmul %0, %1, %cst {dimension_numbers = #tpu.dot_dimension_numbers<[1], [0], [0], [1], [0, 0, 1, 1], [], []>} : vector<512x147xbf16>, vector<147x64xbf16>, vector<512x64xf32> -> vector<512x64xf32>
    %c0_3 = arith.constant 0 : index
    %c0_4 = arith.constant 0 : index
    %3 = vector.load %arg3[%c0_3, %c0_4] : memref<1x64xf32, #tpu.memory_space<vmem>>, vector<1x64xf32>
    %4 = vector.broadcast %3 : vector<1x64xf32> to vector<512x64xf32>
    %5 = arith.addf %2, %4 : vector<512x64xf32>
    %6 = arith.truncf %5 : vector<512x64xf32> to vector<512x64xbf16>
    %c0_5 = arith.constant 0 : index
    %c0_6 = arith.constant 0 : index
    %7 = vector.load %arg4[%c0_5, %c0_6] : memref<512x64xbf16, #tpu.memory_space<vmem>>, vector<512x64xbf16>
    tpu.vector_store %arg4[%c0_5, %c0_6], %6 {strides = array<i32>} : memref<512x64xbf16, #tpu.memory_space<vmem>>, vector<512x64xbf16>,
    return
  }
  func.func @transform_0(%arg0: i32) -> (i32, i32) {
    %c0_i32 = arith.constant 0 : i32
    %c0_i32_0 = arith.constant 0 : i32
    return %arg0, %c0_i32 : i32, i32
  }
  func.func @transform_1(%arg0: i32) -> (i32, i32) {
    %c0_i32 = arith.constant 0 : i32
    %c0_i32_0 = arith.constant 0 : i32
    %c0_i32_1 = arith.constant 0 : i32
    return %c0_i32, %c0_i32_0 : i32, i32
  }
  func.func @transform_2(%arg0: i32) -> (i32, i32) {
    %c0_i32 = arith.constant 0 : i32
    %c0_i32_0 = arith.constant 0 : i32
    %c0_i32_1 = arith.constant 0 : i32
    return %c0_i32, %c0_i32_0 : i32, i32
  }
  func.func @transform_3(%arg0: i32) -> (i32, i32) {
    %c0_i32 = arith.constant 0 : i32
    %c0_i32_0 = arith.constant 0 : i32
    return %arg0, %c0_i32 : i32, i32
  }
}

</mosaic_0001>

<bundles_post_ra>
// kernel: matmul_fused.1
= control target key start
LH: loop header
LB: loop body
LE: loop exit
PB: predicated region body
PF: predicated region fallthrough
CT: control target
= control target key end

     0   :  { %s1696_s12 = smov 0   ;;  %s2153_s0 = inlined_call_operand.vmem [shape: bf16[1024,147], index: 0, kind: input, shape index: {}]   ;;  %s2154_s1 = inlined_call_operand.vmem [shape: bf16[147,64], index: 1, kind: input, shape index: {}]   ;;  %s2155_s2 = inlined_call_operand.vmem [shape: f32[1,64], index: 2, kind: input, shape index: {}]   ;;  %s2156_s3 = inlined_call_operand.vmem [shape: bf16[1024,64], index: 3, kind: output, shape index: {}]  }
   0x1 LB: > { %s1237_s13 = sadd.s32 4294967295, %s1673_s12   ;;  %p1241_p0 = scmp.ge.s32.totalorder %s1673_s12, 1  ;;  %s1673_s12 = sphi %s1696_s12, %s13_s12  }
   0x2   : > { %p139_p1 = scmp.lt.s32.totalorder %s1673_s12, 3 }
   0x4   : > { %p140_p2 = pnand %p1241_p0, %p139_p1 }
   0x5   : > { %s1242_s18 = sshll.u32 (!%p140_p2), %s1237_s13, 6 }
   0x6   : > { %143 = sbr.rel (%p140_p2) target bundleno = 430 (0x1ae), region = 32  ;;  %p165_p3 = scmp.lt.s32.totalorder (!%p140_p2), %s1242_s18, 127 }
   0xb   : > { %v1645_v0 = vld [vmem:[%s2154_s1 + $0x38] sm:$0xff]  ;;  %v260_v1 = vld [vmem:[%s2154_s1 + $0x48] sm:$0x3]  ;;  %vm707_vm0 = vcmask 1040384   ;;  %vm708_vm1 = vcmask 1041408   ;;  %v1644_v3 = vld [vmem:[%s2154_s1 + $0x30] sm:$0xff] }
   0xc   : > { %v590_v2 = vunpack.c.l.b16 %v260_v1  ;;  %714 = vmatpush.bf16.msra.mxu0 %v1645_v0  ;;  %1647 = vmatpush.bf16.msra.mxu2 %v1645_v0  ;;  %v1675_v4 = vmov 65535   ;;  %s2158_s18 = smov (!%p165_p3, %s1242_s18), 127  ;;  %v1643_v9 = vld [vmem:[%s2154_s1 + $0x28] sm:$0xff]  ;;  %v1646_v10 = vld [vmem:[%s2154_s1 + $0x40] sm:$0xff]  ;;  %vm610_vm2 = vcmask 154624   ;;  %v1641_v18 = vld [vmem:[%s2154_s1 + $0x18] sm:$0xff] }
   0xd   : > { %v709_v5 = vsel %vm707_vm0, 4294967295, %v1675_v4  ;;  %s1573_s23 = sshll.u32 %s2158_s18, 3  ;;  %v1642_v14 = vld [vmem:[%s2154_s1 + $0x20] sm:$0xff]  ;;  %v1640_v19 = vld [vmem:[%s2154_s1 + $0x10] sm:$0xff]  ;;  %v1639_v20 = vld [vmem:[%s2154_s1 + $0x8] sm:$0xff]  ;;  %s1246_s15 = sshll.u32 %s2158_s18, 2 }
   0xe   : > { %v600_v6 = vpack.c.b16 %v590_v2, %v590_v2  ;;  %v710_v7 = vsel %vm708_vm1, %v709_v5, 0  ;;  %s1725_s28 = scalar_lea.vmem %s2153_s0, %s1573_s23  ;;  %v1638_v26 = vld [vmem:[%s2154_s1] sm:$0xff]  ;;  %s1852_s19 = scalar_lea.vmem %s2156_s3, %s1246_s15  ;;  %vm1116_vm3 = vcmask 519168  }
   0xf   : > { %v1574_v11 = vld [vmem:[%s1725_s28 + $0x4] sm:$0xf]  ;;  %v1251_v12 = vld [vmem:[%s1725_s28 + $0x8] sm:$0xf0]  ;;  %v1608_v15 = vld [vmem:[%s1725_s28 + $0x114] sm:$0xf] }
  0x10   : > { %v712_v8 = vand.u32 %v710_v7, %v600_v6  ;;  %715 = vmatpush.bf16.msra.mxu0 %v1644_v3  ;;  %1648 = vmatpush.bf16.msra.mxu2 %v1644_v3  ;;  %v1254_v13 = vor.u32 %v1574_v11, %v1251_v12  ;;  %v1387_v16 = vld [vmem:[%s1725_s28 + $0x118] sm:$0xf0]  ;;  %v1576_v21 = vld [vmem:[%s1725_s28 + $0x14] sm:$0xf]  ;;  %v1610_v23 = vld [vmem:[%s1725_s28 + $0x124] sm:$0xf] }
  0x11   : > { %v1390_v17 = vor.u32 %v1608_v15, %v1387_v16  ;;  %v1259_v22 = vld [vmem:[%s1725_s28 + $0x18] sm:$0xf0]  ;;  %v1395_v24 = vld [vmem:[%s1725_s28 + $0x128] sm:$0xf0]  ;;  %v1249_v27 = vld [vmem:[%s1725_s28] sm:$0xf] }
  0x12   : > { %889 = vmatpush.bf16.msra.mxu1 %v712_v8  ;;  %1655 = vmatpush.bf16.msra.mxu3 %v712_v8  ;;  %v1262_v25 = vor.u32 %v1576_v21, %v1259_v22  ;;  %v1575_v28 = vld [vmem:[%s1725_s28 + $0x4] sm:$0xf0]  ;;  %v1377_v29 = vld [vmem:[%s1725_s28 + $0x100] sm:$0xf]  ;;  %v1398_v31 = vor.u32 %v1610_v23, %v1395_v24  ;;  %v1578_v34 = vld [vmem:[%s1725_s28 + $0x24] sm:$0xf] }
  0x13   : > { %v1607_v30 = vld [vmem:[%s1725_s28 + $0x104] sm:$0xf0]  ;;  %v1250_v32 = vor.u32 %v1575_v28, %v1249_v27  ;;  %v1267_v35 = vld [vmem:[%s1725_s28 + $0x28] sm:$0xf0]  ;;  %v1612_v36 = vld [vmem:[%s1725_s28 + $0x134] sm:$0xf] }
  0x14   : > { %716 = vmatpush.bf16.msra.mxu0 %v1643_v9  ;;  %1649 = vmatpush.bf16.msra.mxu2 %v1643_v9  ;;  %v1378_v33 = vor.u32 %v1607_v30, %v1377_v29  ;;  %v1403_v37 = vld [vmem:[%s1725_s28 + $0x138] sm:$0xf0]  ;;  %v1270_v38 = vor.u32 %v1578_v34, %v1267_v35  ;;  %v1257_v39 = vld [vmem:[%s1725_s28 + $0x10] sm:$0xf]  ;;  %v1577_v40 = vld [vmem:[%s1725_s28 + $0x14] sm:$0xf0] }
  0x15   : > { %v1385_v41 = vld [vmem:[%s1725_s28 + $0x110] sm:$0xf]  ;;  %v1609_v42 = vld [vmem:[%s1725_s28 + $0x114] sm:$0xf0]  ;;  %v1406_v43 = vor.u32 %v1612_v36, %v1403_v37  ;;  %v1258_v44 = vor.u32 %v1577_v40, %v1257_v39  ;;  %v1580_v46 = vld [vmem:[%s1725_s28 + $0x34] sm:$0xf] }
  0x16   : > { %890 = vmatpush.bf16.msra.mxu1 %v1646_v10  ;;  %1656 = vmatpush.bf16.msra.mxu3 %v1646_v10  ;;  %v1386_v45 = vor.u32 %v1609_v42, %v1385_v41  ;;  %v1275_v47 = vld [vmem:[%s1725_s28 + $0x38] sm:$0xf0]  ;;  %v1614_v48 = vld [vmem:[%s1725_s28 + $0x144] sm:$0xf]  ;;  %v1411_v49 = vld [vmem:[%s1725_s28 + $0x148] sm:$0xf0] }
  0x17   : > { %v1278_v50 = vor.u32 %v1580_v46, %v1275_v47  ;;  %v1265_v51 = vld [vmem:[%s1725_s28 + $0x20] sm:$0xf]  ;;  %v1579_v52 = vld [vmem:[%s1725_s28 + $0x24] sm:$0xf0]  ;;  %v1414_v55 = vor.u32 %v1614_v48, %v1411_v49  ;;  %v1582_v58 = vld [vmem:[%s1725_s28 + $0x44] sm:$0xf] }
  0x18   : > { %717 = vmatpush.bf16.msra.mxu0 %v1642_v14  ;;  %1650 = vmatpush.bf16.msra.mxu2 %v1642_v14  ;;  %v1393_v53 = vld [vmem:[%s1725_s28 + $0x120] sm:$0xf]  ;;  %v1611_v54 = vld [vmem:[%s1725_s28 + $0x124] sm:$0xf0]  ;;  %v1266_v56 = vor.u32 %v1579_v52, %v1265_v51  ;;  %v1283_v59 = vld [vmem:[%s1725_s28 + $0x48] sm:$0xf0] }
  0x19   : > { %1539 = vmatmul.msk.bf16.vlgmr.msra.gmra.mxu1 %vm610_vm2, %v1254_v13  ;;  %1556 = vmatmul.msk.bf16.vlgmr.msra.gmra.mxu3 %vm610_vm2, %v1390_v17  ;;  %v1394_v57 = vor.u32 %v1611_v54, %v1393_v53  ;;  %v1616_v60 = vld [vmem:[%s1725_s28 + $0x154] sm:$0xf]  ;;  %v1419_v61 = vld [vmem:[%s1725_s28 + $0x158] sm:$0xf0]  ;;  %v1286_v62 = vor.u32 %v1582_v58, %v1283_v59  ;;  %v1273_v63 = vld [vmem:[%s1725_s28 + $0x30] sm:$0xf] }
  0x1a   : > { %v1581_v0 = vld [vmem:[%s1725_s28 + $0x34] sm:$0xf0]  ;;  %v1401_v1 = vld [vmem:[%s1725_s28 + $0x130] sm:$0xf]  ;;  %v1422_v3 = vor.u32 %v1616_v60, %v1419_v61  ;;  %v1584_v6 = vld [vmem:[%s1725_s28 + $0x54] sm:$0xf] }
  0x1b   : > { %v1613_v2 = vld [vmem:[%s1725_s28 + $0x134] sm:$0xf0]  ;;  %v1274_v4 = vor.u32 %v1581_v0, %v1273_v63  ;;  %v1291_v7 = vld [vmem:[%s1725_s28 + $0x58] sm:$0xf0]  ;;  %v1618_v8 = vld [vmem:[%s1725_s28 + $0x164] sm:$0xf] }
  0x1c   : > { %718 = vmatpush.bf16.msra.mxu0 %v1641_v18  ;;  %1651 = vmatpush.bf16.msra.mxu2 %v1641_v18  ;;  %v1402_v5 = vor.u32 %v1613_v2, %v1401_v1  ;;  %v1427_v9 = vld [vmem:[%s1725_s28 + $0x168] sm:$0xf0]  ;;  %v1294_v10 = vor.u32 %v1584_v6, %v1291_v7  ;;  %v1281_v11 = vld [vmem:[%s1725_s28 + $0x40] sm:$0xf]  ;;  %v1583_v12 = vld [vmem:[%s1725_s28 + $0x44] sm:$0xf0] }
  0x1d   : > { %v1409_v13 = vld [vmem:[%s1725_s28 + $0x140] sm:$0xf]  ;;  %v1615_v14 = vld [vmem:[%s1725_s28 + $0x144] sm:$0xf0]  ;;  %v1430_v15 = vor.u32 %v1618_v8, %v1427_v9  ;;  %v1282_v16 = vor.u32 %v1583_v12, %v1281_v11  ;;  %v1586_v18 = vld [vmem:[%s1725_s28 + $0x64] sm:$0xf] }
  0x1e   : > { %v1410_v17 = vor.u32 %v1615_v14, %v1409_v13  ;;  %v1435_v21 = vld [vmem:[%s1725_s28 + $0x178] sm:$0xf0]  ;;  %v1289_v23 = vld [vmem:[%s1725_s28 + $0x50] sm:$0xf]  ;;  %v1585_v24 = vld [vmem:[%s1725_s28 + $0x54] sm:$0xf0] }
  0x1f   : > { %v1290_v28 = vor.u32 %v1585_v24, %v1289_v23  ;;  %v1588_v30 = vld [vmem:[%s1725_s28 + $0x74] sm:$0xf]  ;;  %v1297_v35 = vld [vmem:[%s1725_s28 + $0x60] sm:$0xf]  ;;  %v1587_v36 = vld [vmem:[%s1725_s28 + $0x64] sm:$0xf0] }
  0x20   : > { %719 = vmatpush.bf16.msra.mxu0 %v1640_v19  ;;  %1652 = vmatpush.bf16.msra.mxu2 %v1640_v19  ;;  %v1299_v19 = vld [vmem:[%s1725_s28 + $0x68] sm:$0xf0]  ;;  %v1425_v37 = vld [vmem:[%s1725_s28 + $0x160] sm:$0xf]  ;;  %v1298_v40 = vor.u32 %v1587_v36, %v1297_v35  ;;  %v1590_v42 = vld [vmem:[%s1725_s28 + $0x84] sm:$0xf] }
  0x21   : > { %v1302_v22 = vor.u32 %v1586_v18, %v1299_v19  ;;  %v1305_v47 = vld [vmem:[%s1725_s28 + $0x70] sm:$0xf]  ;;  %v1589_v48 = vld [vmem:[%s1725_s28 + $0x74] sm:$0xf0]  ;;  %v1323_v58 = vld [vmem:[%s1725_s28 + $0x98] sm:$0xf0] }
  0x22   : > { %v1621_v51 = vld [vmem:[%s1725_s28 + $0x174] sm:$0xf0]  ;;  %v1306_v53 = vor.u32 %v1589_v48, %v1305_v47  ;;  %v1626_v59 = vld [vmem:[%s1725_s28 + $0x1a4] sm:$0xf]  ;;  %v1459_v60 = vld [vmem:[%s1725_s28 + $0x1a8] sm:$0xf0] }
  0x23   : > { %v1591_v63 = vld [vmem:[%s1725_s28 + $0x84] sm:$0xf0]  ;;  %v1841_v2 = vld [vmem:[%s2155_s2] ss:$0 sm:$0xff]  ;;  %v1331_v18 = vld [vmem:[%s1725_s28 + $0xa8] sm:$0xf0] }
  0x24   : > { %720 = vmatpush.bf16.msra.mxu0 %v1639_v20  ;;  %1653 = vmatpush.bf16.msra.mxu2 %v1639_v20  ;;  %v1620_v20 = vld [vmem:[%s1725_s28 + $0x174] sm:$0xf]  ;;  %v1321_v23 = vld [vmem:[%s1725_s28 + $0x90] sm:$0xf]  ;;  %v1593_v24 = vld [vmem:[%s1725_s28 + $0x94] sm:$0xf0] }
  0x25   : > { %v1438_v27 = vor.u32 %v1620_v20, %v1435_v21  ;;  %v1628_v20 = vld [vmem:[%s1725_s28 + $0x1b4] sm:$0xf]  ;;  %v1467_v21 = vld [vmem:[%s1725_s28 + $0x1b8] sm:$0xf0]  ;;  %v1630_v48 = vld [vmem:[%s1725_s28 + $0x1c4] sm:$0xf] }
  0x28   : > { %721 = vmatpush.bf16.msra.mxu0 %v1638_v26  ;;  %1654 = vmatpush.bf16.msra.mxu2 %v1638_v26  ;;  %v1617_v26 = vld [vmem:[%s1725_s28 + $0x154] sm:$0xf0] }
  0x29   : > { %1540 = vmatmul.msk.bf16.gmra.mxu1 %vm610_vm2, %v1262_v25  ;;  %1557 = vmatmul.msk.bf16.gmra.mxu3 %vm610_vm2, %v1398_v31  ;;  %v1417_v25 = vld [vmem:[%s1725_s28 + $0x150] sm:$0xf]  ;;  %v1307_v31 = vld [vmem:[%s1725_s28 + $0x78] sm:$0xf0] }
  0x2a   : > { %v1418_v29 = vor.u32 %v1617_v26, %v1417_v25  ;;  %v1310_v34 = vor.u32 %v1588_v30, %v1307_v31  ;;  %v1470_v30 = vor.u32 %v1628_v20, %v1467_v21  ;;  %v1483_v20 = vld [vmem:[%s1725_s28 + $0x1d8] sm:$0xf0] }
  0x2b   : > { %722 = vmatmul.bf16.vlgmr.msra.gmra.mxu0 %v1250_v32  ;;  %802 = vmatmul.bf16.vlgmr.msra.gmra.mxu2 %v1378_v33  ;;  %v1622_v32 = vld [vmem:[%s1725_s28 + $0x184] sm:$0xf]  ;;  %v1443_v33 = vld [vmem:[%s1725_s28 + $0x188] sm:$0xf0] }
  0x2c   : > { %v1446_v39 = vor.u32 %v1622_v32, %v1443_v33  ;;  %v1322_v32 = vor.u32 %v1593_v24, %v1321_v23  ;;  %v1337_v23 = vld [vmem:[%s1725_s28 + $0xb0] sm:$0xf]  ;;  %v1597_v24 = vld [vmem:[%s1725_s28 + $0xb4] sm:$0xf0] }
  0x39   : > { %1541 = vmatmul.msk.bf16.gmra.mxu1 %vm610_vm2, %v1270_v38  ;;  %1558 = vmatmul.msk.bf16.gmra.mxu3 %vm610_vm2, %v1406_v43  ;;  %v1619_v38 = vld [vmem:[%s1725_s28 + $0x164] sm:$0xf0]  ;;  %v1315_v43 = vld [vmem:[%s1725_s28 + $0x88] sm:$0xf0] }
  0x3a   : > { %v1426_v41 = vor.u32 %v1619_v38, %v1425_v37  ;;  %v1318_v46 = vor.u32 %v1590_v42, %v1315_v43 }
  0x3b   : > { %727 = vmatmul.bf16.gmra.mxu0 %v1258_v44  ;;  %807 = vmatmul.bf16.gmra.mxu2 %v1386_v45  ;;  %v1624_v44 = vld [vmem:[%s1725_s28 + $0x194] sm:$0xf]  ;;  %v1451_v45 = vld [vmem:[%s1725_s28 + $0x198] sm:$0xf0] }
  0x3c   : > { %v1454_v52 = vor.u32 %v1624_v44, %v1451_v45  ;;  %v1596_v44 = vld [vmem:[%s1725_s28 + $0xb4] sm:$0xf]  ;;  %v1339_v45 = vld [vmem:[%s1725_s28 + $0xb8] sm:$0xf0] }
  0x49   : > { %1542 = vmatmul.msk.bf16.gmra.mxu1 %vm610_vm2, %v1278_v50  ;;  %1559 = vmatmul.msk.bf16.gmra.mxu3 %vm610_vm2, %v1414_v55  ;;  %v1433_v50 = vld [vmem:[%s1725_s28 + $0x170] sm:$0xf] }
  0x4a   : > { %v1434_v54 = vor.u32 %v1621_v51, %v1433_v50  ;;  %v1342_v51 = vor.u32 %v1596_v44, %v1339_v45 }
  0x4b   : > { %732 = vmatmul.bf16.gmra.mxu0 %v1266_v56  ;;  %812 = vmatmul.bf16.gmra.mxu2 %v1394_v57  ;;  %v1592_v57 = vld [vmem:[%s1725_s28 + $0x94] sm:$0xf] }
  0x4c   : > { %v1326_v61 = vor.u32 %v1592_v57, %v1323_v58  ;;  %v1457_v58 = vld [vmem:[%s1725_s28 + $0x1a0] sm:$0xf] }
  0x59   : > { %1543 = vmatmul.msk.bf16.gmra.mxu1 %vm610_vm2, %v1286_v62  ;;  %1560 = vmatmul.msk.bf16.gmra.mxu3 %vm610_vm2, %v1422_v3  ;;  %v1313_v62 = vld [vmem:[%s1725_s28 + $0x80] sm:$0xf] }
  0x5a   : > { %v1441_v3 = vld [vmem:[%s1725_s28 + $0x180] sm:$0xf]  ;;  %v1314_v6 = vor.u32 %v1591_v63, %v1313_v62 }
  0x5b   : > { %737 = vmatmul.bf16.gmra.mxu0 %v1274_v4  ;;  %817 = vmatmul.bf16.gmra.mxu2 %v1402_v5  ;;  %v1623_v4 = vld [vmem:[%s1725_s28 + $0x184] sm:$0xf0]  ;;  %v1462_v5 = vor.u32 %v1626_v59, %v1459_v60 }
  0x5c   : > { %v1442_v8 = vor.u32 %v1623_v4, %v1441_v3  ;;  %v1627_v59 = vld [vmem:[%s1725_s28 + $0x1a4] sm:$0xf0] }
  0x69   : > { %1544 = vmatmul.msk.bf16.gmra.mxu1 %vm610_vm2, %v1294_v10  ;;  %1561 = vmatmul.msk.bf16.gmra.mxu3 %vm610_vm2, %v1430_v15 }
  0x6b   : > { %742 = vmatmul.bf16.gmra.mxu0 %v1282_v16  ;;  %822 = vmatmul.bf16.gmra.mxu2 %v1410_v17  ;;  %v1594_v17 = vld [vmem:[%s1725_s28 + $0xa4] sm:$0xf] }
  0x79   : > { %1545 = vmatmul.msk.bf16.gmra.mxu1 %vm610_vm2, %v1302_v22  ;;  %1562 = vmatmul.msk.bf16.gmra.mxu3 %vm610_vm2, %v1438_v27  ;;  %v1334_v22 = vor.u32 %v1594_v17, %v1331_v18 }
  0x7b   : > { %747 = vmatmul.bf16.gmra.mxu0 %v1290_v28  ;;  %827 = vmatmul.bf16.gmra.mxu2 %v1418_v29  ;;  %v1449_v28 = vld [vmem:[%s1725_s28 + $0x190] sm:$0xf]  ;;  %v1625_v29 = vld [vmem:[%s1725_s28 + $0x194] sm:$0xf0] }
  0x89   : > { %1546 = vmatmul.msk.bf16.gmra.mxu1 %vm610_vm2, %v1310_v34  ;;  %1563 = vmatmul.msk.bf16.gmra.mxu3 %vm610_vm2, %v1446_v39  ;;  %v1450_v34 = vor.u32 %v1625_v29, %v1449_v28  ;;  %v1465_v29 = vld [vmem:[%s1725_s28 + $0x1b0] sm:$0xf] }
  0x8b   : > { %752 = vmatmul.bf16.gmra.mxu0 %v1298_v40  ;;  %832 = vmatmul.bf16.gmra.mxu2 %v1426_v41 }
  0x96   : > { %v892_v49 = vpop.f32.mrf.mxu1 }
  0x99   : > { %1547 = vmatmul.msk.bf16.gmra.mxu1 %vm610_vm2, %v1318_v46  ;;  %1564 = vmatmul.msk.bf16.gmra.mxu3 %vm610_vm2, %v1454_v52  ;;  %v1329_v52 = vld [vmem:[%s1725_s28 + $0xa0] sm:$0xf] }
  0x9b   : > { %757 = vmatmul.bf16.gmra.mxu0 %v1306_v53  ;;  %837 = vmatmul.bf16.gmra.mxu2 %v1434_v54  ;;  %v1595_v53 = vld [vmem:[%s1725_s28 + $0xa4] sm:$0xf0] }
  0x9c   : > { %v1828_v55 = vpop.f32.mrf.mxu3 }
  0x9e   : > { %v894_v56 = vpop.f32.mrf.mxu1 }
  0xa4   : > { %v1836_v0 = vpop.f32.mrf.mxu3 }
  0xa6   : > { %v897_v1 = vpop.f32.mrf.mxu1 }
  0xa8   : > { %v723_v7 = vpop.f32.mrf.mxu0 }
  0xa9   : > { %1548 = vmatmul.msk.bf16.gmra.mxu1 %vm610_vm2, %v1326_v61  ;;  %v724_v9 = vadd.f32 %v1841_v2, %v723_v7  ;;  %1565 = vmatmul.msk.bf16.gmra.mxu3 %vm610_vm2, %v1462_v5 }
  0xab   : > { %v893_v10 = vadd.f32 %v892_v49, %v724_v9  ;;  %762 = vmatmul.bf16.gmra.mxu0 %v1314_v6  ;;  %842 = vmatmul.bf16.gmra.mxu2 %v1442_v8  ;;  %v1475_v49 = vld [vmem:[%s1725_s28 + $0x1c8] sm:$0xf0] }
  0xac   : > { %v1854_v11 = vpop.f32.mrf.mxu3  ;;  %v1478_v60 = vor.u32 %v1630_v48, %v1475_v49  ;;  %v1600_v48 = vld [vmem:[%s1725_s28 + $0xd4] sm:$0xf]  ;;  %v1355_v49 = vld [vmem:[%s1725_s28 + $0xd8] sm:$0xf0] }
  0xad   : > { %v1052_v12 = vpack.c.bf16 %v893_v10, %v893_v10 }
  0xae   : > { %v899_v13 = vpop.f32.mrf.mxu1  ;;  %v1858_v14 = vpop.f32.mrf.mxu2 }
  0xaf   : > { %1117 = vst.msk [vmem:[%s1852_s19] sm:$0xf] %vm1116_vm3, %v1052_v12 }
  0xb0   : > { %v725_v15 = vpop.f32.mrf.mxu0 }
  0xb1   : > { %v726_v16 = vadd.f32 %v1841_v2, %v725_v15  ;;  %v1598_v15 = vld [vmem:[%s1725_s28 + $0xc4] sm:$0xf] }
  0xb3   : > { %v895_v19 = vadd.f32 %v894_v56, %v726_v16  ;;  %v1347_v16 = vld [vmem:[%s1725_s28 + $0xc8] sm:$0xf0] }
  0xb4   : > { %v1867_v25 = vpop.f32.mrf.mxu3 }
  0xb5   : > { %v1053_v26 = vpack.c.bf16 %v895_v19, %v895_v19  ;;  %v1632_v19 = vld [vmem:[%s1725_s28 + $0x1d4] sm:$0xf] }
  0xb6   : > { %v902_v27 = vpop.f32.mrf.mxu1  ;;  %v1873_v31 = vpop.f32.mrf.mxu2 }
  0xb7   : > { %1118 = vst.msk [vmem:[%s1852_s19 + $0x4] sm:$0xf] %vm1116_vm3, %v1053_v26 }
  0xb8   : > { %v728_v33 = vpop.f32.mrf.mxu0 }
  0xb9   : > { %1549 = vmatmul.msk.bf16.gmra.mxu1 %vm610_vm2, %v1334_v22  ;;  %v729_v35 = vadd.f32 %v1841_v2, %v728_v33  ;;  %1566 = vmatmul.msk.bf16.gmra.mxu3 %vm610_vm2, %v1470_v30  ;;  %v1350_v22 = vor.u32 %v1598_v15, %v1347_v16  ;;  %v1629_v30 = vld [vmem:[%s1725_s28 + $0x1b4] sm:$0xf0] }
  0xbb   : > { %v898_v36 = vadd.f32 %v897_v1, %v729_v35  ;;  %767 = vmatmul.bf16.gmra.mxu0 %v1322_v32  ;;  %847 = vmatmul.bf16.gmra.mxu2 %v1450_v34  ;;  %v1458_v1 = vor.u32 %v1627_v59, %v1457_v58  ;;  %v1486_v32 = vor.u32 %v1632_v19, %v1483_v20  ;;  %v1345_v58 = vld [vmem:[%s1725_s28 + $0xc0] sm:$0xf]  ;;  %v1599_v59 = vld [vmem:[%s1725_s28 + $0xc4] sm:$0xf0]  ;;  %v1602_v19 = vld [vmem:[%s1725_s28 + $0xe4] sm:$0xf] }
  0xbc   : > { %v1878_v37 = vpop.f32.mrf.mxu3  ;;  %v1363_v20 = vld [vmem:[%s1725_s28 + $0xe8] sm:$0xf0] }
  0xbd   : > { %v1054_v38 = vpack.c.bf16 %v898_v36, %v898_v36  ;;  %v1466_v36 = vor.u32 %v1629_v30, %v1465_v29  ;;  %v1353_v29 = vld [vmem:[%s1725_s28 + $0xd0] sm:$0xf]  ;;  %v1601_v30 = vld [vmem:[%s1725_s28 + $0xd4] sm:$0xf0] }
  0xbe   : > { %v904_v39 = vpop.f32.mrf.mxu1  ;;  %v808_v40 = vpop.f32.mrf.mxu2 }
  0xbf   : > { %1119 = vst.msk [vmem:[%s1852_s19 + $0x8] sm:$0xf] %vm1116_vm3, %v1054_v38  ;;  %v809_v41 = vadd.f32 %v1841_v2, %v808_v40 }
  0xc0   : > { %v730_v42 = vpop.f32.mrf.mxu0 }
  0xc1   : > { %v731_v43 = vadd.f32 %v1841_v2, %v730_v42  ;;  %v978_v46 = vadd.f32 %v1828_v55, %v809_v41  ;;  %v1330_v55 = vor.u32 %v1595_v53, %v1329_v52  ;;  %v1634_v52 = vld [vmem:[%s1725_s28 + $0x1e4] sm:$0xf]  ;;  %v1491_v53 = vld [vmem:[%s1725_s28 + $0x1e8] sm:$0xf0] }
  0xc3   : > { %v900_v47 = vadd.f32 %v899_v13, %v731_v43  ;;  %v1086_v50 = vpack.c.bf16 %v978_v46, %v978_v46 }
  0xc4   : > { %v1891_v54 = vpop.f32.mrf.mxu3 }
  0xc5   : > { %v1055_v56 = vpack.c.bf16 %v900_v47, %v900_v47  ;;  %1151 = vst.msk [vmem:[%s1852_s19 + $0x88] sm:$0xf] %vm1116_vm3, %v1086_v50 }
  0xc6   : > { %v907_v57 = vpop.f32.mrf.mxu1  ;;  %v810_v61 = vpop.f32.mrf.mxu2 }
  0xc7   : > { %1120 = vst.msk [vmem:[%s1852_s19 + $0xc] sm:$0xf] %vm1116_vm3, %v1055_v56  ;;  %v811_v62 = vadd.f32 %v1841_v2, %v810_v61 }
  0xc8   : > { %v733_v63 = vpop.f32.mrf.mxu0 }
  0xc9   : > { %1550 = vmatmul.msk.bf16.gmra.mxu1 %vm610_vm2, %v1342_v51  ;;  %v734_v3 = vadd.f32 %v1841_v2, %v733_v63  ;;  %1567 = vmatmul.msk.bf16.gmra.mxu3 %vm610_vm2, %v1478_v60  ;;  %v980_v4 = vadd.f32 %v1836_v0, %v811_v62  ;;  %v1473_v62 = vld [vmem:[%s1725_s28 + $0x1c0] sm:$0xf]  ;;  %v1631_v63 = vld [vmem:[%s1725_s28 + $0x1c4] sm:$0xf0] }
  0xcb   : > { %v903_v5 = vadd.f32 %v902_v27, %v734_v3  ;;  %772 = vmatmul.bf16.gmra.mxu0 %v1330_v55  ;;  %v1087_v6 = vpack.c.bf16 %v980_v4, %v980_v4  ;;  %852 = vmatmul.bf16.gmra.mxu2 %v1458_v1  ;;  %v1494_v1 = vor.u32 %v1634_v52, %v1491_v53  ;;  %v1604_v52 = vld [vmem:[%s1725_s28 + $0xf4] sm:$0xf]  ;;  %v1371_v53 = vld [vmem:[%s1725_s28 + $0xf8] sm:$0xf0] }
  0xcc   : > { %v1904_v7 = vpop.f32.mrf.mxu3 }
  0xcd   : > { %v1056_v8 = vpack.c.bf16 %v903_v5, %v903_v5  ;;  %1152 = vst.msk [vmem:[%s1852_s19 + $0x8c] sm:$0xf] %vm1116_vm3, %v1087_v6  ;;  %v1474_v6 = vor.u32 %v1631_v63, %v1473_v62 }
  0xce   : > { %v909_v9 = vpop.f32.mrf.mxu1  ;;  %v813_v10 = vpop.f32.mrf.mxu2 }
  0xcf   : > { %1121 = vst.msk [vmem:[%s1852_s19 + $0x10] sm:$0xf] %vm1116_vm3, %v1056_v8  ;;  %v814_v12 = vadd.f32 %v1841_v2, %v813_v10 }
  0xd0   : > { %v735_v0 = vpop.f32.mrf.mxu0 }
  0xd1   : > { %v736_v13 = vadd.f32 %v1841_v2, %v735_v0  ;;  %v983_v17 = vadd.f32 %v1854_v11, %v814_v12  ;;  %v1338_v11 = vor.u32 %v1597_v24, %v1337_v23  ;;  %v1636_v23 = vld [vmem:[%s1725_s28 + $0x1f4] sm:$0xf]  ;;  %v1499_v24 = vld [vmem:[%s1725_s28 + $0x1f8] sm:$0xf0] }
  0xd3   : > { %v905_v18 = vadd.f32 %v904_v39, %v736_v13  ;;  %v1088_v21 = vpack.c.bf16 %v983_v17, %v983_v17 }
  0xd4   : > { %v1919_v26 = vpop.f32.mrf.mxu3 }
  0xd5   : > { %v1057_v27 = vpack.c.bf16 %v905_v18, %v905_v18  ;;  %1153 = vst.msk [vmem:[%s1852_s19 + $0x90] sm:$0xf] %vm1116_vm3, %v1088_v21 }
  0xd6   : > { %v912_v28 = vpop.f32.mrf.mxu1  ;;  %v815_v33 = vpop.f32.mrf.mxu2 }
  0xd7   : > { %1122 = vst.msk [vmem:[%s1852_s19 + $0x14] sm:$0xf] %vm1116_vm3, %v1057_v27  ;;  %v816_v34 = vadd.f32 %v1841_v2, %v815_v33 }
  0xd8   : > { %v738_v35 = vpop.f32.mrf.mxu0 }
  0xd9   : > { %1551 = vmatmul.msk.bf16.gmra.mxu1 %vm610_vm2, %v1350_v22  ;;  %v739_v38 = vadd.f32 %v1841_v2, %v738_v35  ;;  %1568 = vmatmul.msk.bf16.gmra.mxu3 %vm610_vm2, %v1486_v32  ;;  %v985_v39 = vadd.f32 %v1867_v25, %v816_v34  ;;  %v1633_v34 = vld [vmem:[%s1725_s28 + $0x1d4] sm:$0xf0] }
  0xdb   : > { %v908_v40 = vadd.f32 %v907_v57, %v739_v38  ;;  %777 = vmatmul.bf16.gmra.mxu0 %v1338_v11  ;;  %v1089_v41 = vpack.c.bf16 %v985_v39, %v985_v39  ;;  %857 = vmatmul.bf16.gmra.mxu2 %v1466_v36  ;;  %v1358_v57 = vor.u32 %v1600_v48, %v1355_v49  ;;  %v1481_v11 = vld [vmem:[%s1725_s28 + $0x1d0] sm:$0xf] }
  0xdc   : > { %v1932_v42 = vpop.f32.mrf.mxu3  ;;  %v1502_v36 = vor.u32 %v1636_v23, %v1499_v24  ;;  %v1354_v38 = vor.u32 %v1601_v30, %v1353_v29  ;;  %v1605_v29 = vld [vmem:[%s1725_s28 + $0xf4] sm:$0xf0] }
  0xdd   : > { %v1058_v43 = vpack.c.bf16 %v908_v40, %v908_v40  ;;  %1154 = vst.msk [vmem:[%s1852_s19 + $0x94] sm:$0xf] %vm1116_vm3, %v1089_v41  ;;  %v1482_v41 = vor.u32 %v1633_v34, %v1481_v11  ;;  %v1637_v11 = vld [vmem:[%s1725_s28 + $0x1f4] sm:$0xf0] }
  0xde   : > { %v914_v44 = vpop.f32.mrf.mxu1  ;;  %v818_v45 = vpop.f32.mrf.mxu2 }
  0xdf   : > { %1123 = vst.msk [vmem:[%s1852_s19 + $0x18] sm:$0xf] %vm1116_vm3, %v1058_v43  ;;  %v819_v46 = vadd.f32 %v1841_v2, %v818_v45 }
  0xe0   : > { %v740_v25 = vpop.f32.mrf.mxu0 }
  0xe1   : > { %v741_v47 = vadd.f32 %v1841_v2, %v740_v25  ;;  %v988_v50 = vadd.f32 %v1878_v37, %v819_v46  ;;  %v1346_v37 = vor.u32 %v1599_v59, %v1345_v58  ;;  %v1374_v59 = vor.u32 %v1604_v52, %v1371_v53 }
  0xe3   : > { %v910_v51 = vadd.f32 %v909_v9, %v741_v47  ;;  %v1090_v56 = vpack.c.bf16 %v988_v50, %v988_v50 }
  0xe4   : > { %v1947_v60 = vpop.f32.mrf.mxu3 }
  0xe5   : > { %v1059_v61 = vpack.c.bf16 %v910_v51, %v910_v51  ;;  %1155 = vst.msk [vmem:[%s1852_s19 + $0x98] sm:$0xf] %vm1116_vm3, %v1090_v56 }
  0xe6   : > { %v917_v55 = vpop.f32.mrf.mxu1  ;;  %v820_v3 = vpop.f32.mrf.mxu2 }
  0xe7   : > { %1124 = vst.msk [vmem:[%s1852_s19 + $0x1c] sm:$0xf] %vm1116_vm3, %v1059_v61  ;;  %v821_v4 = vadd.f32 %v1841_v2, %v820_v3  ;;  %v1361_v61 = vld [vmem:[%s1725_s28 + $0xe0] sm:$0xf]  ;;  %v1635_v3 = vld [vmem:[%s1725_s28 + $0x1e4] sm:$0xf0] }
  0xe8   : > { %v743_v5 = vpop.f32.mrf.mxu0 }
  0xe9   : > { %1552 = vmatmul.msk.bf16.gmra.mxu1 %vm610_vm2, %v1358_v57  ;;  %v744_v8 = vadd.f32 %v1841_v2, %v743_v5  ;;  %1569 = vmatmul.msk.bf16.gmra.mxu3 %vm610_vm2, %v1494_v1  ;;  %v990_v9 = vadd.f32 %v1891_v54, %v821_v4  ;;  %v1489_v1 = vld [vmem:[%s1725_s28 + $0x1e0] sm:$0xf] }
  0xeb   : > { %v913_v10 = vadd.f32 %v912_v28, %v744_v8  ;;  %782 = vmatmul.bf16.gmra.mxu0 %v1346_v37  ;;  %v1091_v12 = vpack.c.bf16 %v990_v9, %v990_v9  ;;  %862 = vmatmul.bf16.gmra.mxu2 %v1474_v6  ;;  %v1366_v28 = vor.u32 %v1602_v19, %v1363_v20  ;;  %v1606_v19 = vld [vmem:[%s1725_s28 + $0x104] sm:$0xf]  ;;  %v1379_v20 = vld [vmem:[%s1725_s28 + $0x108] sm:$0xf0] }
  0xec   : > { %v1960_v0 = vpop.f32.mrf.mxu3  ;;  %v1490_v6 = vor.u32 %v1635_v3, %v1489_v1 }
  0xed   : > { %v1060_v13 = vpack.c.bf16 %v913_v10, %v913_v10  ;;  %1156 = vst.msk [vmem:[%s1852_s19 + $0x9c] sm:$0xf] %vm1116_vm3, %v1091_v12 }
  0xee   : > { %v919_v15 = vpop.f32.mrf.mxu1  ;;  %v823_v16 = vpop.f32.mrf.mxu2 }
  0xef   : > { %1125 = vst.msk [vmem:[%s1852_s19 + $0x20] sm:$0xf] %vm1116_vm3, %v1060_v13  ;;  %v824_v54 = vadd.f32 %v1841_v2, %v823_v16 }
  0xf0   : > { %v745_v17 = vpop.f32.mrf.mxu0 }
  0xf1   : > { %v746_v18 = vadd.f32 %v1841_v2, %v745_v17  ;;  %v993_v21 = vadd.f32 %v1904_v7, %v824_v54 }
  0xf3   : > { %v915_v22 = vadd.f32 %v914_v44, %v746_v18  ;;  %v1092_v27 = vpack.c.bf16 %v993_v21, %v993_v21 }
  0xf4   : > { %v1977_v35 = vpop.f32.mrf.mxu3 }
  0xf5   : > { %v1061_v32 = vpack.c.bf16 %v915_v22, %v915_v22  ;;  %1157 = vst.msk [vmem:[%s1852_s19 + $0xa0] sm:$0xf] %vm1116_vm3, %v1092_v27  ;;  %v1382_v27 = vor.u32 %v1606_v19, %v1379_v20 }
  0xf6   : > { %v922_v33 = vpop.f32.mrf.mxu1  ;;  %v825_v7 = vpop.f32.mrf.mxu2 }
  0xf7   : > { %1126 = vst.msk [vmem:[%s1852_s19 + $0x24] sm:$0xf] %vm1116_vm3, %v1061_v32  ;;  %v826_v39 = vadd.f32 %v1841_v2, %v825_v7 }
  0xf8   : > { %v748_v40 = vpop.f32.mrf.mxu0 }
  0xf9   : > { %1553 = vmatmul.msk.bf16.gmra.mxu1 %vm610_vm2, %v1366_v28  ;;  %v749_v43 = vadd.f32 %v1841_v2, %v748_v40  ;;  %1570 = vmatmul.msk.bf16.gmra.mxu3 %vm610_vm2, %v1502_v36  ;;  %v995_v44 = vadd.f32 %v1919_v26, %v826_v39  ;;  %v1369_v28 = vld [vmem:[%s1725_s28 + $0xf0] sm:$0xf] }
  0xfa   : > { %v1370_v36 = vor.u32 %v1605_v29, %v1369_v28 }
  0xfb   : > { %v918_v45 = vadd.f32 %v917_v55, %v749_v43  ;;  %787 = vmatmul.bf16.gmra.mxu0 %v1354_v38  ;;  %v1093_v46 = vpack.c.bf16 %v995_v44, %v995_v44  ;;  %867 = vmatmul.bf16.gmra.mxu2 %v1482_v41  ;;  %v1603_v55 = vld [vmem:[%s1725_s28 + $0xe4] sm:$0xf0] }
  0xfc   : > { %v1992_v49 = vpop.f32.mrf.mxu3  ;;  %v1362_v4 = vor.u32 %v1603_v55, %v1361_v61 }
  0xfd   : > { %v1062_v25 = vpack.c.bf16 %v918_v45, %v918_v45  ;;  %1158 = vst.msk [vmem:[%s1852_s19 + $0xa4] sm:$0xf] %vm1116_vm3, %v1093_v46 }
  0xfe   : > { %v924_v47 = vpop.f32.mrf.mxu1  ;;  %v828_v48 = vpop.f32.mrf.mxu2 }
  0xff   : > { %1127 = vst.msk [vmem:[%s1852_s19 + $0x28] sm:$0xf] %vm1116_vm3, %v1062_v25  ;;  %v829_v26 = vadd.f32 %v1841_v2, %v828_v48 }
 0x100   : > { %v750_v50 = vpop.f32.mrf.mxu0 }
 0x101   : > { %v751_v51 = vadd.f32 %v1841_v2, %v750_v50  ;;  %v998_v56 = vadd.f32 %v1932_v42, %v829_v26 }
 0x103   : > { %v920_v57 = vadd.f32 %v919_v15, %v751_v51  ;;  %v1094_v58 = vpack.c.bf16 %v998_v56, %v998_v56 }
 0x104   : > { %v1009_v9 = vpop.f32.mrf.mxu3 }
 0x105   : > { %v1063_v62 = vpack.c.bf16 %v920_v57, %v920_v57  ;;  %1159 = vst.msk [vmem:[%s1852_s19 + $0xa8] sm:$0xf] %vm1116_vm3, %v1094_v58 }
 0x106   : > { %v927_v63 = vpop.f32.mrf.mxu1  ;;  %v830_v37 = vpop.f32.mrf.mxu2 }
 0x107   : > { %1128 = vst.msk [vmem:[%s1852_s19 + $0x2c] sm:$0xf] %vm1116_vm3, %v1063_v62  ;;  %v831_v5 = vadd.f32 %v1841_v2, %v830_v37 }
 0x108   : > { %v753_v42 = vpop.f32.mrf.mxu0 }
 0x109   : > { %1554 = vmatmul.msk.bf16.gmra.mxu1 %vm610_vm2, %v1374_v59  ;;  %v754_v8 = vadd.f32 %v1841_v2, %v753_v42  ;;  %v1000_v10 = vadd.f32 %v1947_v60, %v831_v5 }
 0x10b   : > { %v923_v12 = vadd.f32 %v922_v33, %v754_v8  ;;  %792 = vmatmul.bf16.gmra.mxu0 %v1362_v4  ;;  %v1095_v13 = vpack.c.bf16 %v1000_v10, %v1000_v10  ;;  %872 = vmatmul.bf16.gmra.mxu2 %v1490_v6  ;;  %v1497_v33 = vld [vmem:[%s1725_s28 + $0x1f0] sm:$0xf] }
 0x10c   : > { %v1012_v23 = vpop.f32.mrf.mxu3  ;;  %v1498_v38 = vor.u32 %v1637_v11, %v1497_v33 }
 0x10d   : > { %v1064_v15 = vpack.c.bf16 %v923_v12, %v923_v12  ;;  %1160 = vst.msk [vmem:[%s1852_s19 + $0xac] sm:$0xf] %vm1116_vm3, %v1095_v13 }
 0x10e   : > { %v929_v16 = vpop.f32.mrf.mxu1  ;;  %v833_v54 = vpop.f32.mrf.mxu2 }
 0x10f   : > { %1129 = vst.msk [vmem:[%s1852_s19 + $0x30] sm:$0xf] %vm1116_vm3, %v1064_v15  ;;  %v834_v17 = vadd.f32 %v1841_v2, %v833_v54 }
 0x110   : > { %v755_v18 = vpop.f32.mrf.mxu0 }
 0x111   : > { %v756_v60 = vadd.f32 %v1841_v2, %v755_v18  ;;  %v1003_v21 = vadd.f32 %v1960_v0, %v834_v17 }
 0x113   : > { %v925_v22 = vadd.f32 %v924_v47, %v756_v60  ;;  %v1096_v24 = vpack.c.bf16 %v1003_v21, %v1003_v21 }
 0x114   : > { %v1014_v46 = vpop.f32.mrf.mxu3 }
 0x115   : > { %v1065_v30 = vpack.c.bf16 %v925_v22, %v925_v22  ;;  %1161 = vst.msk [vmem:[%s1852_s19 + $0xb0] sm:$0xf] %vm1116_vm3, %v1096_v24 }
 0x116   : > { %v932_v32 = vpop.f32.mrf.mxu1  ;;  %v835_v34 = vpop.f32.mrf.mxu2 }
 0x117   : > { %1130 = vst.msk [vmem:[%s1852_s19 + $0x34] sm:$0xf] %vm1116_vm3, %v1065_v30  ;;  %v836_v0 = vadd.f32 %v1841_v2, %v835_v34 }
 0x118   : > { %v758_v7 = vpop.f32.mrf.mxu0 }
 0x119   : > { %1555 = vmatmul.msk.bf16.gmra.mxu1 %vm610_vm2, %v1382_v27  ;;  %v759_v39 = vadd.f32 %v1841_v2, %v758_v7  ;;  %v1005_v40 = vadd.f32 %v1977_v35, %v836_v0 }
 0x11b   : > { %v928_v41 = vadd.f32 %v927_v63, %v759_v39  ;;  %797 = vmatmul.bf16.gmra.mxu0 %v1370_v36  ;;  %v1097_v43 = vpack.c.bf16 %v1005_v40, %v1005_v40  ;;  %877 = vmatmul.bf16.gmra.mxu2 %v1498_v38 }
 0x11c   : > { %v1017_v57 = vpop.f32.mrf.mxu3 }
 0x11d   : > { %v1066_v44 = vpack.c.bf16 %v928_v41, %v928_v41  ;;  %1162 = vst.msk [vmem:[%s1852_s19 + $0xb4] sm:$0xf] %vm1116_vm3, %v1097_v43 }
 0x11e   : > { %v934_v45 = vpop.f32.mrf.mxu1  ;;  %v838_v25 = vpop.f32.mrf.mxu2 }
 0x11f   : > { %1131 = vst.msk [vmem:[%s1852_s19 + $0x38] sm:$0xf] %vm1116_vm3, %v1066_v44  ;;  %v839_v47 = vadd.f32 %v1841_v2, %v838_v25 }
 0x120   : > { %v760_v48 = vpop.f32.mrf.mxu0 }
 0x121   : > { %v761_v26 = vadd.f32 %v1841_v2, %v760_v48  ;;  %v1008_v35 = vadd.f32 %v1992_v49, %v839_v47 }
 0x123   : > { %v930_v50 = vadd.f32 %v929_v16, %v761_v26  ;;  %v1098_v51 = vpack.c.bf16 %v1008_v35, %v1008_v35 }
 0x124   : > { %v1019_v42 = vpop.f32.mrf.mxu3 }
 0x125   : > { %v1067_v52 = vpack.c.bf16 %v930_v50, %v930_v50  ;;  %1163 = vst.msk [vmem:[%s1852_s19 + $0xb8] sm:$0xf] %vm1116_vm3, %v1098_v51 }
 0x126   : > { %v937_v53 = vpop.f32.mrf.mxu1  ;;  %v840_v56 = vpop.f32.mrf.mxu2 }
 0x127   : > { %1132 = vst.msk [vmem:[%s1852_s19 + $0x3c] sm:$0xf] %vm1116_vm3, %v1067_v52  ;;  %v841_v58 = vadd.f32 %v1841_v2, %v840_v56 }
 0x128   : > { %v763_v59 = vpop.f32.mrf.mxu0 }
 0x129   : > { %v764_v61 = vadd.f32 %v1841_v2, %v763_v59  ;;  %v1010_v55 = vadd.f32 %v1009_v9, %v841_v58 }
 0x12b   : > { %v933_v62 = vadd.f32 %v932_v32, %v764_v61  ;;  %v1099_v49 = vpack.c.bf16 %v1010_v55, %v1010_v55 }
 0x12c   : > { %v1022_v60 = vpop.f32.mrf.mxu3 }
 0x12d   : > { %v1068_v63 = vpack.c.bf16 %v933_v62, %v933_v62  ;;  %1164 = vst.msk [vmem:[%s1852_s19 + $0xbc] sm:$0xf] %vm1116_vm3, %v1099_v49 }
 0x12e   : > { %v939_v1 = vpop.f32.mrf.mxu1  ;;  %v843_v3 = vpop.f32.mrf.mxu2 }
 0x12f   : > { %1133 = vst.msk [vmem:[%s1852_s19 + $0x40] sm:$0xf] %vm1116_vm3, %v1068_v63  ;;  %v844_v37 = vadd.f32 %v1841_v2, %v843_v3 }
 0x130   : > { %v765_v4 = vpop.f32.mrf.mxu0 }
 0x131   : > { %v766_v5 = vadd.f32 %v1841_v2, %v765_v4  ;;  %v1013_v6 = vadd.f32 %v1012_v23, %v844_v37 }
 0x133   : > { %v935_v8 = vadd.f32 %v934_v45, %v766_v5  ;;  %v1100_v9 = vpack.c.bf16 %v1013_v6, %v1013_v6 }
 0x134   : > { %v1024_v11 = vpop.f32.mrf.mxu3 }
 0x135   : > { %v1069_v10 = vpack.c.bf16 %v935_v8, %v935_v8  ;;  %1165 = vst.msk [vmem:[%s1852_s19 + $0xc0] sm:$0xf] %vm1116_vm3, %v1100_v9 }
 0x136   : > { %v942_v12 = vpop.f32.mrf.mxu1  ;;  %v845_v13 = vpop.f32.mrf.mxu2 }
 0x137   : > { %1134 = vst.msk [vmem:[%s1852_s19 + $0x44] sm:$0xf] %vm1116_vm3, %v1069_v10  ;;  %v846_v15 = vadd.f32 %v1841_v2, %v845_v13 }
 0x138   : > { %v768_v16 = vpop.f32.mrf.mxu0 }
 0x139   : > { %v769_v54 = vadd.f32 %v1841_v2, %v768_v16  ;;  %v1015_v17 = vadd.f32 %v1014_v46, %v846_v15 }
 0x13b   : > { %v938_v18 = vadd.f32 %v937_v53, %v769_v54  ;;  %v1101_v19 = vpack.c.bf16 %v1015_v17, %v1015_v17 }
 0x13c   : > { %v1027_v45 = vpop.f32.mrf.mxu3 }
 0x13d   : > { %v1070_v20 = vpack.c.bf16 %v938_v18, %v938_v18  ;;  %1166 = vst.msk [vmem:[%s1852_s19 + $0xc4] sm:$0xf] %vm1116_vm3, %v1101_v19 }
 0x13e   : > { %v944_v21 = vpop.f32.mrf.mxu1  ;;  %v848_v22 = vpop.f32.mrf.mxu2 }
 0x13f   : > { %1135 = vst.msk [vmem:[%s1852_s19 + $0x48] sm:$0xf] %vm1116_vm3, %v1070_v20  ;;  %v849_v23 = vadd.f32 %v1841_v2, %v848_v22 }
 0x140   : > { %v770_v24 = vpop.f32.mrf.mxu0 }
 0x141   : > { %v771_v27 = vadd.f32 %v1841_v2, %v770_v24  ;;  %v1018_v28 = vadd.f32 %v1017_v57, %v849_v23 }
 0x143   : > { %v940_v29 = vadd.f32 %v939_v1, %v771_v27  ;;  %v1102_v30 = vpack.c.bf16 %v1018_v28, %v1018_v28 }
 0x144   : > { %v1029_v58 = vpop.f32.mrf.mxu3 }
 0x145   : > { %v1071_v32 = vpack.c.bf16 %v940_v29, %v940_v29  ;;  %1167 = vst.msk [vmem:[%s1852_s19 + $0xc8] sm:$0xf] %vm1116_vm3, %v1102_v30 }
 0x146   : > { %v947_v33 = vpop.f32.mrf.mxu1  ;;  %v850_v34 = vpop.f32.mrf.mxu2 }
 0x147   : > { %1136 = vst.msk [vmem:[%s1852_s19 + $0x4c] sm:$0xf] %vm1116_vm3, %v1071_v32  ;;  %v851_v36 = vadd.f32 %v1841_v2, %v850_v34 }
 0x148   : > { %v773_v0 = vpop.f32.mrf.mxu0 }
 0x149   : > { %v774_v7 = vadd.f32 %v1841_v2, %v773_v0  ;;  %v1020_v38 = vadd.f32 %v1019_v42, %v851_v36 }
 0x14b   : > { %v943_v39 = vadd.f32 %v942_v12, %v774_v7  ;;  %v1103_v40 = vpack.c.bf16 %v1020_v38, %v1020_v38 }
 0x14c   : > { %v1032_v42 = vpop.f32.mrf.mxu3 }
 0x14d   : > { %v1072_v41 = vpack.c.bf16 %v943_v39, %v943_v39  ;;  %1168 = vst.msk [vmem:[%s1852_s19 + $0xcc] sm:$0xf] %vm1116_vm3, %v1103_v40 }
 0x14e   : > { %v949_v43 = vpop.f32.mrf.mxu1  ;;  %v853_v44 = vpop.f32.mrf.mxu2 }
 0x14f   : > { %1137 = vst.msk [vmem:[%s1852_s19 + $0x50] sm:$0xf] %vm1116_vm3, %v1072_v41  ;;  %v854_v46 = vadd.f32 %v1841_v2, %v853_v44 }
 0x150   : > { %v775_v25 = vpop.f32.mrf.mxu0 }
 0x151   : > { %v776_v47 = vadd.f32 %v1841_v2, %v775_v25  ;;  %v1023_v48 = vadd.f32 %v1022_v60, %v854_v46 }
 0x153   : > { %v945_v26 = vadd.f32 %v944_v21, %v776_v47  ;;  %v1104_v35 = vpack.c.bf16 %v1023_v48, %v1023_v48 }
 0x154   : > { %v1034_v19 = vpop.f32.mrf.mxu3 }
 0x155   : > { %v1073_v50 = vpack.c.bf16 %v945_v26, %v945_v26  ;;  %1169 = vst.msk [vmem:[%s1852_s19 + $0xd0] sm:$0xf] %vm1116_vm3, %v1104_v35 }
 0x156   : > { %v952_v51 = vpop.f32.mrf.mxu1  ;;  %v855_v52 = vpop.f32.mrf.mxu2 }
 0x157   : > { %1138 = vst.msk [vmem:[%s1852_s19 + $0x54] sm:$0xf] %vm1116_vm3, %v1073_v50  ;;  %v856_v53 = vadd.f32 %v1841_v2, %v855_v52 }
 0x158   : > { %v778_v56 = vpop.f32.mrf.mxu0 }
 0x159   : > { %v779_v57 = vadd.f32 %v1841_v2, %v778_v56  ;;  %v1025_v59 = vadd.f32 %v1024_v11, %v856_v53 }
 0x15b   : > { %v948_v61 = vadd.f32 %v947_v33, %v779_v57  ;;  %v1105_v55 = vpack.c.bf16 %v1025_v59, %v1025_v59 }
 0x15c   : > { %v1037_v33 = vpop.f32.mrf.mxu3 }
 0x15d   : > { %v1074_v62 = vpack.c.bf16 %v948_v61, %v948_v61  ;;  %1170 = vst.msk [vmem:[%s1852_s19 + $0xd4] sm:$0xf] %vm1116_vm3, %v1105_v55 }
 0x15e   : > { %v954_v49 = vpop.f32.mrf.mxu1  ;;  %v858_v63 = vpop.f32.mrf.mxu2 }
 0x15f   : > { %1139 = vst.msk [vmem:[%s1852_s19 + $0x58] sm:$0xf] %vm1116_vm3, %v1074_v62  ;;  %v859_v1 = vadd.f32 %v1841_v2, %v858_v63 }
 0x160   : > { %v780_v3 = vpop.f32.mrf.mxu0 }
 0x161   : > { %v781_v37 = vadd.f32 %v1841_v2, %v780_v3  ;;  %v1028_v4 = vadd.f32 %v1027_v45, %v859_v1 }
 0x163   : > { %v950_v5 = vadd.f32 %v949_v43, %v781_v37  ;;  %v1106_v6 = vpack.c.bf16 %v1028_v4, %v1028_v4  ;;  %v804_v4 = vadd.f32 %v1841_v2, %v1858_v14 }
 0x164   : > { %v1039_v46 = vpop.f32.mrf.mxu3 }
 0x165   : > { %v1075_v8 = vpack.c.bf16 %v950_v5, %v950_v5  ;;  %1171 = vst.msk [vmem:[%s1852_s19 + $0xd8] sm:$0xf] %vm1116_vm3, %v1106_v6 }
 0x166   : > { %v957_v9 = vpop.f32.mrf.mxu1  ;;  %v860_v10 = vpop.f32.mrf.mxu2 }
 0x167   : > { %1140 = vst.msk [vmem:[%s1852_s19 + $0x5c] sm:$0xf] %vm1116_vm3, %v1075_v8  ;;  %v861_v12 = vadd.f32 %v1841_v2, %v860_v10 }
 0x168   : > { %v783_v13 = vpop.f32.mrf.mxu0 }
 0x169   : > { %v784_v15 = vadd.f32 %v1841_v2, %v783_v13  ;;  %v1030_v16 = vadd.f32 %v1029_v58, %v861_v12 }
 0x16b   : > { %v953_v54 = vadd.f32 %v952_v51, %v784_v15  ;;  %v1107_v17 = vpack.c.bf16 %v1030_v16, %v1030_v16 }
 0x16c   : > { %v1042_v58 = vpop.f32.mrf.mxu3 }
 0x16d   : > { %v1076_v18 = vpack.c.bf16 %v953_v54, %v953_v54  ;;  %1172 = vst.msk [vmem:[%s1852_s19 + $0xdc] sm:$0xf] %vm1116_vm3, %v1107_v17  ;;  %v806_v17 = vadd.f32 %v1841_v2, %v1873_v31 }
 0x16e   : > { %v959_v60 = vpop.f32.mrf.mxu1  ;;  %v863_v20 = vpop.f32.mrf.mxu2 }
 0x16f   : > { %1141 = vst.msk [vmem:[%s1852_s19 + $0x60] sm:$0xf] %vm1116_vm3, %v1076_v18  ;;  %v864_v21 = vadd.f32 %v1841_v2, %v863_v20 }
 0x170   : > { %v785_v22 = vpop.f32.mrf.mxu0 }
 0x171   : > { %v786_v23 = vadd.f32 %v1841_v2, %v785_v22  ;;  %v1033_v24 = vadd.f32 %v1032_v42, %v864_v21 }
 0x173   : > { %v955_v27 = vadd.f32 %v954_v49, %v786_v23  ;;  %v1108_v28 = vpack.c.bf16 %v1033_v24, %v1033_v24 }
 0x174   : > { %v1044_v6 = vpop.f32.mrf.mxu3 }
 0x175   : > { %v1077_v29 = vpack.c.bf16 %v955_v27, %v955_v27  ;;  %1173 = vst.msk [vmem:[%s1852_s19 + $0xe0] sm:$0xf] %vm1116_vm3, %v1108_v28 }
 0x176   : > { %v962_v30 = vpop.f32.mrf.mxu1  ;;  %v865_v32 = vpop.f32.mrf.mxu2 }
 0x177   : > { %1142 = vst.msk [vmem:[%s1852_s19 + $0x64] sm:$0xf] %vm1116_vm3, %v1077_v29  ;;  %v866_v11 = vadd.f32 %v1841_v2, %v865_v32 }
 0x178   : > { %v788_v34 = vpop.f32.mrf.mxu0 }
 0x179   : > { %v789_v36 = vadd.f32 %v1841_v2, %v788_v34  ;;  %v1035_v0 = vadd.f32 %v1034_v19, %v866_v11 }
 0x17b   : > { %v958_v7 = vadd.f32 %v957_v9, %v789_v36  ;;  %v1109_v38 = vpack.c.bf16 %v1035_v0, %v1035_v0 }
 0x17c   : > { %v1047_v21 = vpop.f32.mrf.mxu3 }
 0x17d   : > { %v1078_v39 = vpack.c.bf16 %v958_v7, %v958_v7  ;;  %1174 = vst.msk [vmem:[%s1852_s19 + $0xe4] sm:$0xf] %vm1116_vm3, %v1109_v38 }
 0x17e   : > { %v964_v40 = vpop.f32.mrf.mxu1  ;;  %v868_v41 = vpop.f32.mrf.mxu2 }
 0x17f   : > { %1143 = vst.msk [vmem:[%s1852_s19 + $0x68] sm:$0xf] %vm1116_vm3, %v1078_v39  ;;  %v869_v43 = vadd.f32 %v1841_v2, %v868_v41 }
 0x180   : > { %v790_v44 = vpop.f32.mrf.mxu0 }
 0x181   : > { %v791_v45 = vadd.f32 %v1841_v2, %v790_v44  ;;  %v1038_v25 = vadd.f32 %v1037_v33, %v869_v43 }
 0x183   : > { %v960_v47 = vadd.f32 %v959_v60, %v791_v45  ;;  %v1110_v48 = vpack.c.bf16 %v1038_v25, %v1038_v25 }
 0x184   : > { %v1049_v34 = vpop.f32.mrf.mxu3 }
 0x185   : > { %v1079_v26 = vpack.c.bf16 %v960_v47, %v960_v47  ;;  %1175 = vst.msk [vmem:[%s1852_s19 + $0xe8] sm:$0xf] %vm1116_vm3, %v1110_v48 }
 0x186   : > { %v967_v35 = vpop.f32.mrf.mxu1  ;;  %v870_v50 = vpop.f32.mrf.mxu2 }
 0x187   : > { %1144 = vst.msk [vmem:[%s1852_s19 + $0x6c] sm:$0xf] %vm1116_vm3, %v1079_v26  ;;  %v871_v51 = vadd.f32 %v1841_v2, %v870_v50 }
 0x188   : > { %v793_v52 = vpop.f32.mrf.mxu0 }
 0x189   : > { %v794_v53 = vadd.f32 %v1841_v2, %v793_v52  ;;  %v1040_v56 = vadd.f32 %v1039_v46, %v871_v51 }
 0x18b   : > { %v963_v57 = vadd.f32 %v962_v30, %v794_v53  ;;  %v1111_v59 = vpack.c.bf16 %v1040_v56, %v1040_v56 }
 0x18d   : > { %v1080_v61 = vpack.c.bf16 %v963_v57, %v963_v57  ;;  %1176 = vst.msk [vmem:[%s1852_s19 + $0xec] sm:$0xf] %vm1116_vm3, %v1111_v59 }
 0x18e   : > { %v969_v55 = vpop.f32.mrf.mxu1  ;;  %v873_v62 = vpop.f32.mrf.mxu2 }
 0x18f   : > { %1145 = vst.msk [vmem:[%s1852_s19 + $0x70] sm:$0xf] %vm1116_vm3, %v1080_v61  ;;  %v874_v49 = vadd.f32 %v1841_v2, %v873_v62 }
 0x190   : > { %v795_v63 = vpop.f32.mrf.mxu0 }
 0x191   : > { %v796_v1 = vadd.f32 %v1841_v2, %v795_v63  ;;  %v1043_v3 = vadd.f32 %v1042_v58, %v874_v49 }
 0x193   : > { %v965_v37 = vadd.f32 %v964_v40, %v796_v1  ;;  %v1112_v5 = vpack.c.bf16 %v1043_v3, %v1043_v3 }
 0x195   : > { %v1081_v42 = vpack.c.bf16 %v965_v37, %v965_v37  ;;  %1177 = vst.msk [vmem:[%s1852_s19 + $0xf0] sm:$0xf] %vm1116_vm3, %v1112_v5 }
 0x196   : > { %v972_v8 = vpop.f32.mrf.mxu1  ;;  %v875_v10 = vpop.f32.mrf.mxu2 }
 0x197   : > { %v973_v9 = vadd.f32 %v972_v8, %v804_v4  ;;  %1146 = vst.msk [vmem:[%s1852_s19 + $0x74] sm:$0xf] %vm1116_vm3, %v1081_v42  ;;  %v876_v13 = vadd.f32 %v1841_v2, %v875_v10 }
 0x198   : > { %v798_v15 = vpop.f32.mrf.mxu0 }
 0x199   : > { %v1084_v12 = vpack.c.bf16 %v973_v9, %v973_v9  ;;  %v799_v16 = vadd.f32 %v1841_v2, %v798_v15  ;;  %v1045_v14 = vadd.f32 %v1044_v6, %v876_v13 }
 0x19b   : > { %1149 = vst.msk [vmem:[%s1852_s19 + $0x80] sm:$0xf] %vm1116_vm3, %v1084_v12  ;;  %v968_v54 = vadd.f32 %v967_v35, %v799_v16  ;;  %v1113_v18 = vpack.c.bf16 %v1045_v14, %v1045_v14 }
 0x19d   : > { %v1082_v60 = vpack.c.bf16 %v968_v54, %v968_v54  ;;  %1178 = vst.msk [vmem:[%s1852_s19 + $0xf4] sm:$0xf] %vm1116_vm3, %v1113_v18 }
 0x19e   : > { %v974_v19 = vpop.f32.mrf.mxu1  ;;  %v878_v22 = vpop.f32.mrf.mxu2 }
 0x19f   : > { %v975_v20 = vadd.f32 %v974_v19, %v806_v17  ;;  %1147 = vst.msk [vmem:[%s1852_s19 + $0x78] sm:$0xf] %vm1116_vm3, %v1082_v60  ;;  %v879_v24 = vadd.f32 %v1841_v2, %v878_v22 }
 0x1a0   : > { %v800_v27 = vpop.f32.mrf.mxu0 }
 0x1a1   : > { %v1085_v23 = vpack.c.bf16 %v975_v20, %v975_v20  ;;  %v801_v28 = vadd.f32 %v1841_v2, %v800_v27  ;;  %v1048_v31 = vadd.f32 %v1047_v21, %v879_v24 }
 0x1a3   : > { %1150 = vst.msk [vmem:[%s1852_s19 + $0x84] sm:$0xf] %vm1116_vm3, %v1085_v23  ;;  %v970_v29 = vadd.f32 %v969_v55, %v801_v28  ;;  %v1114_v30 = vpack.c.bf16 %v1048_v31, %v1048_v31 }
 0x1a5   : > { %v1083_v32 = vpack.c.bf16 %v970_v29, %v970_v29  ;;  %1179 = vst.msk [vmem:[%s1852_s19 + $0xf8] sm:$0xf] %vm1116_vm3, %v1114_v30 }
 0x1a6   : > { %v880_v33 = vpop.f32.mrf.mxu2 }
 0x1a7   : > { %1148 = vst.msk [vmem:[%s1852_s19 + $0x7c] sm:$0xf] %vm1116_vm3, %v1083_v32  ;;  %v881_v11 = vadd.f32 %v1841_v2, %v880_v33 }
 0x1a9   : > { %v1050_v36 = vadd.f32 %v1049_v34, %v881_v11 }
 0x1ab   : > { %v1115_v0 = vpack.c.bf16 %v1050_v36, %v1050_v36 }
 0x1ad   : > { %1180 = vst.msk [vmem:[%s1852_s19 + $0xfc] sm:$0xf] %vm1116_vm3, %v1115_v0 }
 0x1ae PF: > { %s13_s12 = sadd.s32 1, %s1673_s12  }
 0x1af   : > { %p10_p4 = scmp.ge.s32.totalorder %s13_s12, 4  }
 0x1b1   :  { %12 = sbr.rel (!%p10_p4) target bundleno = 1 (0x1), region = 62 }

</bundles_post_ra>
